<compile_context>
chip_gen: v5e
topology: v5e:2x2
jax: 0.10.0
libtpu: 0.0.40
codegen_flags: <defaults>
</compile_context>

<pallas_src>
import math
import functools

import numpy as np
import jax
import jax.numpy as jnp
from jax import lax
from jax.experimental import pallas as pl
from jax.experimental.pallas import tpu as pltpu


# -----------------------------------------------------------------------------
# Kernel: full 3x3 same-padded conv for one batch element / one Cout tile.
#   x_ref : (1, Cin, H*W)     flattened image (resident across Cout tiles)
#   w_ref : (9, Cout_t, Cin)  packed weights, tap index k = ky*3 + kx
#   b_ref : (Cout_t, 1)       bias
#   o_ref : (1, Cout_t, H*W)  lane-dense output block
# -----------------------------------------------------------------------------
def _conv3x3_kernel(x_ref, w_ref, b_ref, o_ref, *, H, W, Cin):
    HW = H * W
    x = x_ref[0]                                          # (Cin, H*W)

    idx = lax.broadcasted_iota(jnp.int32, (Cin, HW), 1)   # flattened position
    if (W & (W - 1)) == 0:                                # power-of-two fast path
        col = jnp.bitwise_and(idx, W - 1)
    else:
        col = idx % W

    cout_t = o_ref.shape[1]
    acc = jnp.zeros((cout_t, HW), jnp.float32)

    for ky in range(3):
        dy = ky - 1
        for kx in range(3):
            dx = kx - 1
            off = dy * W + dx                             # flattened tap offset
            # shifted[i] = x[i + off]  (circular; wrap-around masked below)
            v = x if off == 0 else pltpu.roll(x, shift=(-off) % HW, axis=1)
            # Mask taps that fall outside the zero-padded image.
            if dy == -1:
                v = jnp.where(idx >= W, v, 0.0)           # output row 0
            elif dy == 1:
                v = jnp.where(idx < (H - 1) * W, v, 0.0)  # output row H-1
            if dx == -1:
                v = jnp.where(col >= 1, v, 0.0)           # output col 0
            elif dx == 1:
                v = jnp.where(col <= W - 2, v, 0.0)       # output col W-1
            acc = acc + jnp.dot(w_ref[ky * 3 + kx], v,
                                preferred_element_type=jnp.float32)

    acc = acc + b_ref[...]
    o_ref[0] = acc.astype(o_ref.dtype)


def _choose_cout_tile(Cout, HW, itemsize, target_bytes=2 << 20):
    """Largest Cout tile that divides Cout, is sublane-friendly, fits budget."""
    cands = [c for c in range(8, Cout + 1, 8) if Cout % c == 0]
    if not cands:
        return Cout
    fitting = [c for c in cands if c * HW * itemsize <= target_bytes]
    return max(fitting) if fitting else min(cands)


def conv3x3_shuffle_stage(x, w9, b_col, r):
    """One [3x3 same conv -> PixelShuffle(r)] stage.  x: (N, C, H, W) NCHW."""
    N, Cin, H, W = x.shape
    assert w9.shape[0] == 9 and w9.shape[2] == Cin
    Cout = w9.shape[1]
    assert Cout % (r * r) == 0
    HW = H * W

    TCO = _choose_cout_tile(Cout, HW, jnp.dtype(x.dtype).itemsize)
    n_co = Cout // TCO

    xf = x.reshape(N, Cin, HW)        # contiguous reshape: free, no HBM pass

    kernel = functools.partial(_conv3x3_kernel, H=H, W=W, Cin=Cin)
    yf = pl.pallas_call(
        kernel,
        out_shape=jax.ShapeDtypeStruct((N, Cout, HW), x.dtype),
        grid_spec=pltpu.PrefetchScalarGridSpec(
            num_scalar_prefetch=0,
            grid=(N, n_co),
            in_specs=[
                # whole flattened image; constant over the Cout-tile axis
                pl.BlockSpec((1, Cin, HW), lambda n, co: (n, 0, 0)),
                # packed weights / bias, tiled over Cout
                pl.BlockSpec((9, TCO, Cin), lambda n, co: (0, co, 0)),
                pl.BlockSpec((TCO, 1), lambda n, co: (co, 0)),
            ],
            out_specs=pl.BlockSpec((1, TCO, HW), lambda n, co: (n, co, 0)),
        ),
        compiler_params=pltpu.CompilerParams(
            dimension_semantics=("parallel", "parallel")),
    )(xf, w9, b_col)

    # PixelShuffle(r): (N, C*r*r, H, W) -> (N, C, H*r, W*r), PyTorch ordering.
    C = Cout // (r * r)
    y = yf.reshape(N, C, r, r, H, W)
    y = jnp.transpose(y, (0, 1, 4, 2, 5, 3))
    return y.reshape(N, C, H * r, W * r)


# -----------------------------------------------------------------------------
# One-time parameter packing + forward pass
# -----------------------------------------------------------------------------
def prepare_params(weights_oihw, biases):
    """Pack conv params once: OIHW -> (9, Cout, Cin), tap index k = ky*3 + kx."""
    packed_w, packed_b = [], []
    for w, b in zip(weights_oihw, biases):
        Cout, Cin = w.shape[0], w.shape[1]
        packed_w.append(jnp.transpose(w, (2, 3, 0, 1)).reshape(9, Cout, Cin))
        packed_b.append(b.reshape(Cout, 1).astype(jnp.float32))
    return packed_w, packed_b


def upsample_block(x, packed_weights, packed_biases, scale):
    """Forward pass of _UpsampleBlock: repeated [conv3x3 ; PixelShuffle]."""
    if scale in (2, 4, 8):
        r, n_stages = 2, int(round(math.log2(scale)))
    elif scale == 3:
        r, n_stages = 3, 1
    else:
        raise ValueError("scale must be 2, 3, 4, or 8")
    assert len(packed_weights) == n_stages and len(packed_biases) == n_stages
    for i in range(n_stages):
        x = conv3x3_shuffle_stage(x, packed_weights[i], packed_biases[i], r)
    return x


# -----------------------------------------------------------------------------
# Pure-JAX (XLA) reference for correctness checking.
# -----------------------------------------------------------------------------
def _reference(x_nchw, weights, biases, scale):
    if scale in (2, 4, 8):
        r, n_stages = 2, int(round(math.log2(scale)))
    else:
        r, n_stages = 3, 1
    x = x_nchw
    for s in range(n_stages):
        y = lax.conv_general_dilated(
            x, weights[s], window_strides=(1, 1), padding=((1, 1), (1, 1)),
            dimension_numbers=("NCHW", "OIHW", "NCHW"),
            precision=lax.Precision.HIGHEST)
        y = y + biases[s][None, :, None, None]
        N, Crr, H, W = y.shape
        C = Crr // (r * r)
        y = y.reshape(N, C, r, r, H, W)
        y = jnp.transpose(y, (0, 1, 4, 2, 5, 3)).reshape(N, C, H * r, W * r)
        x = y
    return x


if __name__ == "__main__":
    N, C, H, W = 2, 4, 16, 16
    scale = 4          # two [conv ; PixelShuffle(2)] stages
    n_stages = int(round(math.log2(scale)))

    key = jax.random.PRNGKey(0)
    kx_key, key = jax.random.split(key)
    x = jax.random.normal(kx_key, (N, C, H, W), dtype=jnp.float32)

    # Deterministic parameter init (kaiming-uniform-like bounds, seeded).
    weights, biases = [], []
    for s in range(n_stages):
        kw, kb, key = jax.random.split(key, 3)
        fan_in = C * 3 * 3
        bound = 1.0 / math.sqrt(fan_in)
        w = jax.random.uniform(kw, (4 * C, C, 3, 3), jnp.float32, -bound, bound)
        b = jax.random.uniform(kb, (4 * C,), jnp.float32, -bound, bound)
        weights.append(w)
        biases.append(b)

    packed_w, packed_b = prepare_params(weights, biases)   # one-time transform
    fwd = jax.jit(functools.partial(upsample_block, scale=scale))

    out = jax.block_until_ready(fwd(x, packed_w, packed_b))
    ref = jax.block_until_ready(_reference(x, weights, biases, scale))

    assert out.shape == (N, C, H * scale, W * scale), out.shape
    err = float(np.max(np.abs(np.asarray(out) - np.asarray(ref))))
    assert np.allclose(np.asarray(out), np.asarray(ref), rtol=1e-3, atol=1e-3), err

    print("KERNEL_OK")
</pallas_src>

<mosaic_0001>
module attributes {stable_mosaic.version = 11 : i64} {
  func.func @_conv3x3_kernel(%arg0: i32, %arg1: i32, %arg2: memref<1x4x256xf32, #tpu.memory_space<vmem>>, %arg3: memref<9x16x4xf32, #tpu.memory_space<vmem>>, %arg4: memref<16x1xf32, #tpu.memory_space<vmem>>, %arg5: memref<1x16x256xf32, #tpu.memory_space<vmem>>) attributes {dimension_semantics = [#tpu.dimension_semantics<parallel>, #tpu.dimension_semantics<parallel>], iteration_bounds = array<i64: 2, 1>, scalar_prefetch = 0 : i64, scratch_operands = 0 : i64, tpu.core_type = #tpu.core_type<tc>, window_params = [{transform_indices = @transform_0, window_bounds = array<i64: 1, 4, 256>}, {transform_indices = @transform_1, window_bounds = array<i64: 9, 16, 4>}, {transform_indices = @transform_2, window_bounds = array<i64: 16, 1>}, {transform_indices = @transform_3, window_bounds = array<i64: 1, 16, 256>}]} {
    %c0 = arith.constant 0 : index
    %c0_0 = arith.constant 0 : index
    %c0_1 = arith.constant 0 : index
    %0 = vector.load %arg2[%c0, %c0_0, %c0_1] : memref<1x4x256xf32, #tpu.memory_space<vmem>>, vector<1x4x256xf32>
    %1 = vector.shape_cast %0 : vector<1x4x256xf32> to vector<4x256xf32>
    %2 = tpu.iota {dimensions = array<i32: 1>} : vector<4x256xi32>
    %c15_i32 = arith.constant 15 : i32
    %3 = vector.broadcast %c15_i32 : i32 to vector<4x256xi32>
    %4 = arith.andi %2, %3 : vector<4x256xi32>
    %cst = arith.constant 0.000000e+00 : f32
    %5 = vector.broadcast %cst : f32 to vector<16x256xf32>
    %c17_i32 = arith.constant 17 : i32
    %6 = tpu.dynamic_rotate %1 by %c17_i32 dim 1 : vector<4x256xf32>, i32 -> vector<4x256xf32>
    %c16_i32 = arith.constant 16 : i32
    %7 = vector.broadcast %c16_i32 : i32 to vector<4x256xi32>
    %8 = arith.cmpi sge, %2, %7 : vector<4x256xi32>
    %cst_2 = arith.constant 0.000000e+00 : f32
    %9 = vector.broadcast %cst_2 : f32 to vector<4x256xf32>
    %10 = arith.select %8, %6, %9 : vector<4x256xi1>, vector<4x256xf32>
    %c1_i32 = arith.constant 1 : i32
    %11 = vector.broadcast %c1_i32 : i32 to vector<4x256xi32>
    %12 = arith.cmpi sge, %4, %11 : vector<4x256xi32>
    %cst_3 = arith.constant 0.000000e+00 : f32
    %13 = vector.broadcast %cst_3 : f32 to vector<4x256xf32>
    %14 = arith.select %12, %10, %13 : vector<4x256xi1>, vector<4x256xf32>
    %c0_4 = arith.constant 0 : index
    %c0_5 = arith.constant 0 : index
    %c0_6 = arith.constant 0 : index
    %15 = vector.load %arg3[%c0_4, %c0_5, %c0_6] : memref<9x16x4xf32, #tpu.memory_space<vmem>>, vector<1x16x4xf32>
    %16 = vector.shape_cast %15 : vector<1x16x4xf32> to vector<16x4xf32>
    %cst_7 = arith.constant dense<0.000000e+00> : vector<16x256xf32>
    %17 = tpu.matmul %16, %14, %cst_7 {dimension_numbers = #tpu.dot_dimension_numbers<[1], [0], [0], [1], [0, 0, 1, 1], [], []>} : vector<16x4xf32>, vector<4x256xf32>, vector<16x256xf32> -> vector<16x256xf32>
    %18 = arith.addf %5, %17 : vector<16x256xf32>
    %c16_i32_8 = arith.constant 16 : i32
    %19 = tpu.dynamic_rotate %1 by %c16_i32_8 dim 1 : vector<4x256xf32>, i32 -> vector<4x256xf32>
    %c16_i32_9 = arith.constant 16 : i32
    %20 = vector.broadcast %c16_i32_9 : i32 to vector<4x256xi32>
    %21 = arith.cmpi sge, %2, %20 : vector<4x256xi32>
    %cst_10 = arith.constant 0.000000e+00 : f32
    %22 = vector.broadcast %cst_10 : f32 to vector<4x256xf32>
    %23 = arith.select %21, %19, %22 : vector<4x256xi1>, vector<4x256xf32>
    %c1 = arith.constant 1 : index
    %c0_11 = arith.constant 0 : index
    %c0_12 = arith.constant 0 : index
    %24 = vector.load %arg3[%c1, %c0_11, %c0_12] : memref<9x16x4xf32, #tpu.memory_space<vmem>>, vector<1x16x4xf32>
    %25 = vector.shape_cast %24 : vector<1x16x4xf32> to vector<16x4xf32>
    %cst_13 = arith.constant dense<0.000000e+00> : vector<16x256xf32>
    %26 = tpu.matmul %25, %23, %cst_13 {dimension_numbers = #tpu.dot_dimension_numbers<[1], [0], [0], [1], [0, 0, 1, 1], [], []>} : vector<16x4xf32>, vector<4x256xf32>, vector<16x256xf32> -> vector<16x256xf32>
    %27 = arith.addf %18, %26 : vector<16x256xf32>
    %c15_i32_14 = arith.constant 15 : i32
    %28 = tpu.dynamic_rotate %1 by %c15_i32_14 dim 1 : vector<4x256xf32>, i32 -> vector<4x256xf32>
    %c16_i32_15 = arith.constant 16 : i32
    %29 = vector.broadcast %c16_i32_15 : i32 to vector<4x256xi32>
    %30 = arith.cmpi sge, %2, %29 : vector<4x256xi32>
    %cst_16 = arith.constant 0.000000e+00 : f32
    %31 = vector.broadcast %cst_16 : f32 to vector<4x256xf32>
    %32 = arith.select %30, %28, %31 : vector<4x256xi1>, vector<4x256xf32>
    %c14_i32 = arith.constant 14 : i32
    %33 = vector.broadcast %c14_i32 : i32 to vector<4x256xi32>
    %34 = arith.cmpi sle, %4, %33 : vector<4x256xi32>
    %cst_17 = arith.constant 0.000000e+00 : f32
    %35 = vector.broadcast %cst_17 : f32 to vector<4x256xf32>
    %36 = arith.select %34, %32, %35 : vector<4x256xi1>, vector<4x256xf32>
    %c2 = arith.constant 2 : index
    %c0_18 = arith.constant 0 : index
    %c0_19 = arith.constant 0 : index
    %37 = vector.load %arg3[%c2, %c0_18, %c0_19] : memref<9x16x4xf32, #tpu.memory_space<vmem>>, vector<1x16x4xf32>
    %38 = vector.shape_cast %37 : vector<1x16x4xf32> to vector<16x4xf32>
    %cst_20 = arith.constant dense<0.000000e+00> : vector<16x256xf32>
    %39 = tpu.matmul %38, %36, %cst_20 {dimension_numbers = #tpu.dot_dimension_numbers<[1], [0], [0], [1], [0, 0, 1, 1], [], []>} : vector<16x4xf32>, vector<4x256xf32>, vector<16x256xf32> -> vector<16x256xf32>
    %40 = arith.addf %27, %39 : vector<16x256xf32>
    %c1_i32_21 = arith.constant 1 : i32
    %41 = tpu.dynamic_rotate %1 by %c1_i32_21 dim 1 : vector<4x256xf32>, i32 -> vector<4x256xf32>
    %c1_i32_22 = arith.constant 1 : i32
    %42 = vector.broadcast %c1_i32_22 : i32 to vector<4x256xi32>
    %43 = arith.cmpi sge, %4, %42 : vector<4x256xi32>
    %cst_23 = arith.constant 0.000000e+00 : f32
    %44 = vector.broadcast %cst_23 : f32 to vector<4x256xf32>
    %45 = arith.select %43, %41, %44 : vector<4x256xi1>, vector<4x256xf32>
    %c3 = arith.constant 3 : index
    %c0_24 = arith.constant 0 : index
    %c0_25 = arith.constant 0 : index
    %46 = vector.load %arg3[%c3, %c0_24, %c0_25] : memref<9x16x4xf32, #tpu.memory_space<vmem>>, vector<1x16x4xf32>
    %47 = vector.shape_cast %46 : vector<1x16x4xf32> to vector<16x4xf32>
    %cst_26 = arith.constant dense<0.000000e+00> : vector<16x256xf32>
    %48 = tpu.matmul %47, %45, %cst_26 {dimension_numbers = #tpu.dot_dimension_numbers<[1], [0], [0], [1], [0, 0, 1, 1], [], []>} : vector<16x4xf32>, vector<4x256xf32>, vector<16x256xf32> -> vector<16x256xf32>
    %49 = arith.addf %40, %48 : vector<16x256xf32>
    %c4 = arith.constant 4 : index
    %c0_27 = arith.constant 0 : index
    %c0_28 = arith.constant 0 : index
    %50 = vector.load %arg3[%c4, %c0_27, %c0_28] : memref<9x16x4xf32, #tpu.memory_space<vmem>>, vector<1x16x4xf32>
    %51 = vector.shape_cast %50 : vector<1x16x4xf32> to vector<16x4xf32>
    %cst_29 = arith.constant dense<0.000000e+00> : vector<16x256xf32>
    %52 = tpu.matmul %51, %1, %cst_29 {dimension_numbers = #tpu.dot_dimension_numbers<[1], [0], [0], [1], [0, 0, 1, 1], [], []>} : vector<16x4xf32>, vector<4x256xf32>, vector<16x256xf32> -> vector<16x256xf32>
    %53 = arith.addf %49, %52 : vector<16x256xf32>
    %c255_i32 = arith.constant 255 : i32
    %54 = tpu.dynamic_rotate %1 by %c255_i32 dim 1 : vector<4x256xf32>, i32 -> vector<4x256xf32>
    %c14_i32_30 = arith.constant 14 : i32
    %55 = vector.broadcast %c14_i32_30 : i32 to vector<4x256xi32>
    %56 = arith.cmpi sle, %4, %55 : vector<4x256xi32>
    %cst_31 = arith.constant 0.000000e+00 : f32
    %57 = vector.broadcast %cst_31 : f32 to vector<4x256xf32>
    %58 = arith.select %56, %54, %57 : vector<4x256xi1>, vector<4x256xf32>
    %c5 = arith.constant 5 : index
    %c0_32 = arith.constant 0 : index
    %c0_33 = arith.constant 0 : index
    %59 = vector.load %arg3[%c5, %c0_32, %c0_33] : memref<9x16x4xf32, #tpu.memory_space<vmem>>, vector<1x16x4xf32>
    %60 = vector.shape_cast %59 : vector<1x16x4xf32> to vector<16x4xf32>
    %cst_34 = arith.constant dense<0.000000e+00> : vector<16x256xf32>
    %61 = tpu.matmul %60, %58, %cst_34 {dimension_numbers = #tpu.dot_dimension_numbers<[1], [0], [0], [1], [0, 0, 1, 1], [], []>} : vector<16x4xf32>, vector<4x256xf32>, vector<16x256xf32> -> vector<16x256xf32>
    %62 = arith.addf %53, %61 : vector<16x256xf32>
    %c241_i32 = arith.constant 241 : i32
    %63 = tpu.dynamic_rotate %1 by %c241_i32 dim 1 : vector<4x256xf32>, i32 -> vector<4x256xf32>
    %c240_i32 = arith.constant 240 : i32
    %64 = vector.broadcast %c240_i32 : i32 to vector<4x256xi32>
    %65 = arith.cmpi slt, %2, %64 : vector<4x256xi32>
    %cst_35 = arith.constant 0.000000e+00 : f32
    %66 = vector.broadcast %cst_35 : f32 to vector<4x256xf32>
    %67 = arith.select %65, %63, %66 : vector<4x256xi1>, vector<4x256xf32>
    %c1_i32_36 = arith.constant 1 : i32
    %68 = vector.broadcast %c1_i32_36 : i32 to vector<4x256xi32>
    %69 = arith.cmpi sge, %4, %68 : vector<4x256xi32>
    %cst_37 = arith.constant 0.000000e+00 : f32
    %70 = vector.broadcast %cst_37 : f32 to vector<4x256xf32>
    %71 = arith.select %69, %67, %70 : vector<4x256xi1>, vector<4x256xf32>
    %c6 = arith.constant 6 : index
    %c0_38 = arith.constant 0 : index
    %c0_39 = arith.constant 0 : index
    %72 = vector.load %arg3[%c6, %c0_38, %c0_39] : memref<9x16x4xf32, #tpu.memory_space<vmem>>, vector<1x16x4xf32>
    %73 = vector.shape_cast %72 : vector<1x16x4xf32> to vector<16x4xf32>
    %cst_40 = arith.constant dense<0.000000e+00> : vector<16x256xf32>
    %74 = tpu.matmul %73, %71, %cst_40 {dimension_numbers = #tpu.dot_dimension_numbers<[1], [0], [0], [1], [0, 0, 1, 1], [], []>} : vector<16x4xf32>, vector<4x256xf32>, vector<16x256xf32> -> vector<16x256xf32>
    %75 = arith.addf %62, %74 : vector<16x256xf32>
    %c240_i32_41 = arith.constant 240 : i32
    %76 = tpu.dynamic_rotate %1 by %c240_i32_41 dim 1 : vector<4x256xf32>, i32 -> vector<4x256xf32>
    %c240_i32_42 = arith.constant 240 : i32
    %77 = vector.broadcast %c240_i32_42 : i32 to vector<4x256xi32>
    %78 = arith.cmpi slt, %2, %77 : vector<4x256xi32>
    %cst_43 = arith.constant 0.000000e+00 : f32
    %79 = vector.broadcast %cst_43 : f32 to vector<4x256xf32>
    %80 = arith.select %78, %76, %79 : vector<4x256xi1>, vector<4x256xf32>
    %c7 = arith.constant 7 : index
    %c0_44 = arith.constant 0 : index
    %c0_45 = arith.constant 0 : index
    %81 = vector.load %arg3[%c7, %c0_44, %c0_45] : memref<9x16x4xf32, #tpu.memory_space<vmem>>, vector<1x16x4xf32>
    %82 = vector.shape_cast %81 : vector<1x16x4xf32> to vector<16x4xf32>
    %cst_46 = arith.constant dense<0.000000e+00> : vector<16x256xf32>
    %83 = tpu.matmul %82, %80, %cst_46 {dimension_numbers = #tpu.dot_dimension_numbers<[1], [0], [0], [1], [0, 0, 1, 1], [], []>} : vector<16x4xf32>, vector<4x256xf32>, vector<16x256xf32> -> vector<16x256xf32>
    %84 = arith.addf %75, %83 : vector<16x256xf32>
    %c239_i32 = arith.constant 239 : i32
    %85 = tpu.dynamic_rotate %1 by %c239_i32 dim 1 : vector<4x256xf32>, i32 -> vector<4x256xf32>
    %c240_i32_47 = arith.constant 240 : i32
    %86 = vector.broadcast %c240_i32_47 : i32 to vector<4x256xi32>
    %87 = arith.cmpi slt, %2, %86 : vector<4x256xi32>
    %cst_48 = arith.constant 0.000000e+00 : f32
    %88 = vector.broadcast %cst_48 : f32 to vector<4x256xf32>
    %89 = arith.select %87, %85, %88 : vector<4x256xi1>, vector<4x256xf32>
    %c14_i32_49 = arith.constant 14 : i32
    %90 = vector.broadcast %c14_i32_49 : i32 to vector<4x256xi32>
    %91 = arith.cmpi sle, %4, %90 : vector<4x256xi32>
    %cst_50 = arith.constant 0.000000e+00 : f32
    %92 = vector.broadcast %cst_50 : f32 to vector<4x256xf32>
    %93 = arith.select %91, %89, %92 : vector<4x256xi1>, vector<4x256xf32>
    %c8 = arith.constant 8 : index
    %c0_51 = arith.constant 0 : index
    %c0_52 = arith.constant 0 : index
    %94 = vector.load %arg3[%c8, %c0_51, %c0_52] : memref<9x16x4xf32, #tpu.memory_space<vmem>>, vector<1x16x4xf32>
    %95 = vector.shape_cast %94 : vector<1x16x4xf32> to vector<16x4xf32>
    %cst_53 = arith.constant dense<0.000000e+00> : vector<16x256xf32>
    %96 = tpu.matmul %95, %93, %cst_53 {dimension_numbers = #tpu.dot_dimension_numbers<[1], [0], [0], [1], [0, 0, 1, 1], [], []>} : vector<16x4xf32>, vector<4x256xf32>, vector<16x256xf32> -> vector<16x256xf32>
    %97 = arith.addf %84, %96 : vector<16x256xf32>
    %c0_54 = arith.constant 0 : index
    %c0_55 = arith.constant 0 : index
    %98 = vector.load %arg4[%c0_54, %c0_55] : memref<16x1xf32, #tpu.memory_space<vmem>>, vector<16x1xf32>
    %99 = vector.broadcast %98 : vector<16x1xf32> to vector<16x256xf32>
    %100 = arith.addf %97, %99 : vector<16x256xf32>
    %c0_56 = arith.constant 0 : index
    %c0_57 = arith.constant 0 : index
    %c0_58 = arith.constant 0 : index
    %101 = vector.load %arg5[%c0_56, %c0_57, %c0_58] : memref<1x16x256xf32, #tpu.memory_space<vmem>>, vector<1x16x256xf32>
    %102 = vector.shape_cast %101 : vector<1x16x256xf32> to vector<16x256xf32>
    %103 = vector.shape_cast %100 : vector<16x256xf32> to vector<1x16x256xf32>
    tpu.vector_store %arg5[%c0_56, %c0_57, %c0_58], %103 {strides = array<i32>} : memref<1x16x256xf32, #tpu.memory_space<vmem>>, vector<1x16x256xf32>,
    return
  }
  func.func @transform_0(%arg0: i32, %arg1: i32) -> (i32, i32, i32) {
    %c0_i32 = arith.constant 0 : i32
    %c0_i32_0 = arith.constant 0 : i32
    %c0_i32_1 = arith.constant 0 : i32
    return %arg0, %c0_i32, %c0_i32_0 : i32, i32, i32
  }
  func.func @transform_1(%arg0: i32, %arg1: i32) -> (i32, i32, i32) {
    %c0_i32 = arith.constant 0 : i32
    %c0_i32_0 = arith.constant 0 : i32
    %c0_i32_1 = arith.constant 0 : i32
    return %c0_i32, %arg1, %c0_i32_0 : i32, i32, i32
  }
  func.func @transform_2(%arg0: i32, %arg1: i32) -> (i32, i32) {
    %c0_i32 = arith.constant 0 : i32
    %c0_i32_0 = arith.constant 0 : i32
    return %arg1, %c0_i32 : i32, i32
  }
  func.func @transform_3(%arg0: i32, %arg1: i32) -> (i32, i32, i32) {
    %c0_i32 = arith.constant 0 : i32
    %c0_i32_0 = arith.constant 0 : i32
    return %arg0, %arg1, %c0_i32 : i32, i32, i32
  }
}

module attributes {stable_mosaic.version = 11 : i64} {
  func.func @_conv3x3_kernel(%arg0: i32, %arg1: i32, %arg2: memref<1x4x1024xf32, #tpu.memory_space<vmem>>, %arg3: memref<9x16x4xf32, #tpu.memory_space<vmem>>, %arg4: memref<16x1xf32, #tpu.memory_space<vmem>>, %arg5: memref<1x16x1024xf32, #tpu.memory_space<vmem>>) attributes {dimension_semantics = [#tpu.dimension_semantics<parallel>, #tpu.dimension_semantics<parallel>], iteration_bounds = array<i64: 2, 1>, scalar_prefetch = 0 : i64, scratch_operands = 0 : i64, tpu.core_type = #tpu.core_type<tc>, window_params = [{transform_indices = @transform_0, window_bounds = array<i64: 1, 4, 1024>}, {transform_indices = @transform_1, window_bounds = array<i64: 9, 16, 4>}, {transform_indices = @transform_2, window_bounds = array<i64: 16, 1>}, {transform_indices = @transform_3, window_bounds = array<i64: 1, 16, 1024>}]} {
    %c0 = arith.constant 0 : index
    %c0_0 = arith.constant 0 : index
    %c0_1 = arith.constant 0 : index
    %0 = vector.load %arg2[%c0, %c0_0, %c0_1] : memref<1x4x1024xf32, #tpu.memory_space<vmem>>, vector<1x4x1024xf32>
    %1 = vector.shape_cast %0 : vector<1x4x1024xf32> to vector<4x1024xf32>
    %2 = tpu.iota {dimensions = array<i32: 1>} : vector<4x1024xi32>
    %c31_i32 = arith.constant 31 : i32
    %3 = vector.broadcast %c31_i32 : i32 to vector<4x1024xi32>
    %4 = arith.andi %2, %3 : vector<4x1024xi32>
    %cst = arith.constant 0.000000e+00 : f32
    %5 = vector.broadcast %cst : f32 to vector<16x1024xf32>
    %c33_i32 = arith.constant 33 : i32
    %6 = tpu.dynamic_rotate %1 by %c33_i32 dim 1 : vector<4x1024xf32>, i32 -> vector<4x1024xf32>
    %c32_i32 = arith.constant 32 : i32
    %7 = vector.broadcast %c32_i32 : i32 to vector<4x1024xi32>
    %8 = arith.cmpi sge, %2, %7 : vector<4x1024xi32>
    %cst_2 = arith.constant 0.000000e+00 : f32
    %9 = vector.broadcast %cst_2 : f32 to vector<4x1024xf32>
    %10 = arith.select %8, %6, %9 : vector<4x1024xi1>, vector<4x1024xf32>
    %c1_i32 = arith.constant 1 : i32
    %11 = vector.broadcast %c1_i32 : i32 to vector<4x1024xi32>
    %12 = arith.cmpi sge, %4, %11 : vector<4x1024xi32>
    %cst_3 = arith.constant 0.000000e+00 : f32
    %13 = vector.broadcast %cst_3 : f32 to vector<4x1024xf32>
    %14 = arith.select %12, %10, %13 : vector<4x1024xi1>, vector<4x1024xf32>
    %c0_4 = arith.constant 0 : index
    %c0_5 = arith.constant 0 : index
    %c0_6 = arith.constant 0 : index
    %15 = vector.load %arg3[%c0_4, %c0_5, %c0_6] : memref<9x16x4xf32, #tpu.memory_space<vmem>>, vector<1x16x4xf32>
    %16 = vector.shape_cast %15 : vector<1x16x4xf32> to vector<16x4xf32>
    %cst_7 = arith.constant dense<0.000000e+00> : vector<16x1024xf32>
    %17 = tpu.matmul %16, %14, %cst_7 {dimension_numbers = #tpu.dot_dimension_numbers<[1], [0], [0], [1], [0, 0, 1, 1], [], []>} : vector<16x4xf32>, vector<4x1024xf32>, vector<16x1024xf32> -> vector<16x1024xf32>
    %18 = arith.addf %5, %17 : vector<16x1024xf32>
    %c32_i32_8 = arith.constant 32 : i32
    %19 = tpu.dynamic_rotate %1 by %c32_i32_8 dim 1 : vector<4x1024xf32>, i32 -> vector<4x1024xf32>
    %c32_i32_9 = arith.constant 32 : i32
    %20 = vector.broadcast %c32_i32_9 : i32 to vector<4x1024xi32>
    %21 = arith.cmpi sge, %2, %20 : vector<4x1024xi32>
    %cst_10 = arith.constant 0.000000e+00 : f32
    %22 = vector.broadcast %cst_10 : f32 to vector<4x1024xf32>
    %23 = arith.select %21, %19, %22 : vector<4x1024xi1>, vector<4x1024xf32>
    %c1 = arith.constant 1 : index
    %c0_11 = arith.constant 0 : index
    %c0_12 = arith.constant 0 : index
    %24 = vector.load %arg3[%c1, %c0_11, %c0_12] : memref<9x16x4xf32, #tpu.memory_space<vmem>>, vector<1x16x4xf32>
    %25 = vector.shape_cast %24 : vector<1x16x4xf32> to vector<16x4xf32>
    %cst_13 = arith.constant dense<0.000000e+00> : vector<16x1024xf32>
    %26 = tpu.matmul %25, %23, %cst_13 {dimension_numbers = #tpu.dot_dimension_numbers<[1], [0], [0], [1], [0, 0, 1, 1], [], []>} : vector<16x4xf32>, vector<4x1024xf32>, vector<16x1024xf32> -> vector<16x1024xf32>
    %27 = arith.addf %18, %26 : vector<16x1024xf32>
    %c31_i32_14 = arith.constant 31 : i32
    %28 = tpu.dynamic_rotate %1 by %c31_i32_14 dim 1 : vector<4x1024xf32>, i32 -> vector<4x1024xf32>
    %c32_i32_15 = arith.constant 32 : i32
    %29 = vector.broadcast %c32_i32_15 : i32 to vector<4x1024xi32>
    %30 = arith.cmpi sge, %2, %29 : vector<4x1024xi32>
    %cst_16 = arith.constant 0.000000e+00 : f32
    %31 = vector.broadcast %cst_16 : f32 to vector<4x1024xf32>
    %32 = arith.select %30, %28, %31 : vector<4x1024xi1>, vector<4x1024xf32>
    %c30_i32 = arith.constant 30 : i32
    %33 = vector.broadcast %c30_i32 : i32 to vector<4x1024xi32>
    %34 = arith.cmpi sle, %4, %33 : vector<4x1024xi32>
    %cst_17 = arith.constant 0.000000e+00 : f32
    %35 = vector.broadcast %cst_17 : f32 to vector<4x1024xf32>
    %36 = arith.select %34, %32, %35 : vector<4x1024xi1>, vector<4x1024xf32>
    %c2 = arith.constant 2 : index
    %c0_18 = arith.constant 0 : index
    %c0_19 = arith.constant 0 : index
    %37 = vector.load %arg3[%c2, %c0_18, %c0_19] : memref<9x16x4xf32, #tpu.memory_space<vmem>>, vector<1x16x4xf32>
    %38 = vector.shape_cast %37 : vector<1x16x4xf32> to vector<16x4xf32>
    %cst_20 = arith.constant dense<0.000000e+00> : vector<16x1024xf32>
    %39 = tpu.matmul %38, %36, %cst_20 {dimension_numbers = #tpu.dot_dimension_numbers<[1], [0], [0], [1], [0, 0, 1, 1], [], []>} : vector<16x4xf32>, vector<4x1024xf32>, vector<16x1024xf32> -> vector<16x1024xf32>
    %40 = arith.addf %27, %39 : vector<16x1024xf32>
    %c1_i32_21 = arith.constant 1 : i32
    %41 = tpu.dynamic_rotate %1 by %c1_i32_21 dim 1 : vector<4x1024xf32>, i32 -> vector<4x1024xf32>
    %c1_i32_22 = arith.constant 1 : i32
    %42 = vector.broadcast %c1_i32_22 : i32 to vector<4x1024xi32>
    %43 = arith.cmpi sge, %4, %42 : vector<4x1024xi32>
    %cst_23 = arith.constant 0.000000e+00 : f32
    %44 = vector.broadcast %cst_23 : f32 to vector<4x1024xf32>
    %45 = arith.select %43, %41, %44 : vector<4x1024xi1>, vector<4x1024xf32>
    %c3 = arith.constant 3 : index
    %c0_24 = arith.constant 0 : index
    %c0_25 = arith.constant 0 : index
    %46 = vector.load %arg3[%c3, %c0_24, %c0_25] : memref<9x16x4xf32, #tpu.memory_space<vmem>>, vector<1x16x4xf32>
    %47 = vector.shape_cast %46 : vector<1x16x4xf32> to vector<16x4xf32>
    %cst_26 = arith.constant dense<0.000000e+00> : vector<16x1024xf32>
    %48 = tpu.matmul %47, %45, %cst_26 {dimension_numbers = #tpu.dot_dimension_numbers<[1], [0], [0], [1], [0, 0, 1, 1], [], []>} : vector<16x4xf32>, vector<4x1024xf32>, vector<16x1024xf32> -> vector<16x1024xf32>
    %49 = arith.addf %40, %48 : vector<16x1024xf32>
    %c4 = arith.constant 4 : index
    %c0_27 = arith.constant 0 : index
    %c0_28 = arith.constant 0 : index
    %50 = vector.load %arg3[%c4, %c0_27, %c0_28] : memref<9x16x4xf32, #tpu.memory_space<vmem>>, vector<1x16x4xf32>
    %51 = vector.shape_cast %50 : vector<1x16x4xf32> to vector<16x4xf32>
    %cst_29 = arith.constant dense<0.000000e+00> : vector<16x1024xf32>
    %52 = tpu.matmul %51, %1, %cst_29 {dimension_numbers = #tpu.dot_dimension_numbers<[1], [0], [0], [1], [0, 0, 1, 1], [], []>} : vector<16x4xf32>, vector<4x1024xf32>, vector<16x1024xf32> -> vector<16x1024xf32>
    %53 = arith.addf %49, %52 : vector<16x1024xf32>
    %c1023_i32 = arith.constant 1023 : i32
    %54 = tpu.dynamic_rotate %1 by %c1023_i32 dim 1 : vector<4x1024xf32>, i32 -> vector<4x1024xf32>
    %c30_i32_30 = arith.constant 30 : i32
    %55 = vector.broadcast %c30_i32_30 : i32 to vector<4x1024xi32>
    %56 = arith.cmpi sle, %4, %55 : vector<4x1024xi32>
    %cst_31 = arith.constant 0.000000e+00 : f32
    %57 = vector.broadcast %cst_31 : f32 to vector<4x1024xf32>
    %58 = arith.select %56, %54, %57 : vector<4x1024xi1>, vector<4x1024xf32>
    %c5 = arith.constant 5 : index
    %c0_32 = arith.constant 0 : index
    %c0_33 = arith.constant 0 : index
    %59 = vector.load %arg3[%c5, %c0_32, %c0_33] : memref<9x16x4xf32, #tpu.memory_space<vmem>>, vector<1x16x4xf32>
    %60 = vector.shape_cast %59 : vector<1x16x4xf32> to vector<16x4xf32>
    %cst_34 = arith.constant dense<0.000000e+00> : vector<16x1024xf32>
    %61 = tpu.matmul %60, %58, %cst_34 {dimension_numbers = #tpu.dot_dimension_numbers<[1], [0], [0], [1], [0, 0, 1, 1], [], []>} : vector<16x4xf32>, vector<4x1024xf32>, vector<16x1024xf32> -> vector<16x1024xf32>
    %62 = arith.addf %53, %61 : vector<16x1024xf32>
    %c993_i32 = arith.constant 993 : i32
    %63 = tpu.dynamic_rotate %1 by %c993_i32 dim 1 : vector<4x1024xf32>, i32 -> vector<4x1024xf32>
    %c992_i32 = arith.constant 992 : i32
    %64 = vector.broadcast %c992_i32 : i32 to vector<4x1024xi32>
    %65 = arith.cmpi slt, %2, %64 : vector<4x1024xi32>
    %cst_35 = arith.constant 0.000000e+00 : f32
    %66 = vector.broadcast %cst_35 : f32 to vector<4x1024xf32>
    %67 = arith.select %65, %63, %66 : vector<4x1024xi1>, vector<4x1024xf32>
    %c1_i32_36 = arith.constant 1 : i32
    %68 = vector.broadcast %c1_i32_36 : i32 to vector<4x1024xi32>
    %69 = arith.cmpi sge, %4, %68 : vector<4x1024xi32>
    %cst_37 = arith.constant 0.000000e+00 : f32
    %70 = vector.broadcast %cst_37 : f32 to vector<4x1024xf32>
    %71 = arith.select %69, %67, %70 : vector<4x1024xi1>, vector<4x1024xf32>
    %c6 = arith.constant 6 : index
    %c0_38 = arith.constant 0 : index
    %c0_39 = arith.constant 0 : index
    %72 = vector.load %arg3[%c6, %c0_38, %c0_39] : memref<9x16x4xf32, #tpu.memory_space<vmem>>, vector<1x16x4xf32>
    %73 = vector.shape_cast %72 : vector<1x16x4xf32> to vector<16x4xf32>
    %cst_40 = arith.constant dense<0.000000e+00> : vector<16x1024xf32>
    %74 = tpu.matmul %73, %71, %cst_40 {dimension_numbers = #tpu.dot_dimension_numbers<[1], [0], [0], [1], [0, 0, 1, 1], [], []>} : vector<16x4xf32>, vector<4x1024xf32>, vector<16x1024xf32> -> vector<16x1024xf32>
    %75 = arith.addf %62, %74 : vector<16x1024xf32>
    %c992_i32_41 = arith.constant 992 : i32
    %76 = tpu.dynamic_rotate %1 by %c992_i32_41 dim 1 : vector<4x1024xf32>, i32 -> vector<4x1024xf32>
    %c992_i32_42 = arith.constant 992 : i32
    %77 = vector.broadcast %c992_i32_42 : i32 to vector<4x1024xi32>
    %78 = arith.cmpi slt, %2, %77 : vector<4x1024xi32>
    %cst_43 = arith.constant 0.000000e+00 : f32
    %79 = vector.broadcast %cst_43 : f32 to vector<4x1024xf32>
    %80 = arith.select %78, %76, %79 : vector<4x1024xi1>, vector<4x1024xf32>
    %c7 = arith.constant 7 : index
    %c0_44 = arith.constant 0 : index
    %c0_45 = arith.constant 0 : index
    %81 = vector.load %arg3[%c7, %c0_44, %c0_45] : memref<9x16x4xf32, #tpu.memory_space<vmem>>, vector<1x16x4xf32>
    %82 = vector.shape_cast %81 : vector<1x16x4xf32> to vector<16x4xf32>
    %cst_46 = arith.constant dense<0.000000e+00> : vector<16x1024xf32>
    %83 = tpu.matmul %82, %80, %cst_46 {dimension_numbers = #tpu.dot_dimension_numbers<[1], [0], [0], [1], [0, 0, 1, 1], [], []>} : vector<16x4xf32>, vector<4x1024xf32>, vector<16x1024xf32> -> vector<16x1024xf32>
    %84 = arith.addf %75, %83 : vector<16x1024xf32>
    %c991_i32 = arith.constant 991 : i32
    %85 = tpu.dynamic_rotate %1 by %c991_i32 dim 1 : vector<4x1024xf32>, i32 -> vector<4x1024xf32>
    %c992_i32_47 = arith.constant 992 : i32
    %86 = vector.broadcast %c992_i32_47 : i32 to vector<4x1024xi32>
    %87 = arith.cmpi slt, %2, %86 : vector<4x1024xi32>
    %cst_48 = arith.constant 0.000000e+00 : f32
    %88 = vector.broadcast %cst_48 : f32 to vector<4x1024xf32>
    %89 = arith.select %87, %85, %88 : vector<4x1024xi1>, vector<4x1024xf32>
    %c30_i32_49 = arith.constant 30 : i32
    %90 = vector.broadcast %c30_i32_49 : i32 to vector<4x1024xi32>
    %91 = arith.cmpi sle, %4, %90 : vector<4x1024xi32>
    %cst_50 = arith.constant 0.000000e+00 : f32
    %92 = vector.broadcast %cst_50 : f32 to vector<4x1024xf32>
    %93 = arith.select %91, %89, %92 : vector<4x1024xi1>, vector<4x1024xf32>
    %c8 = arith.constant 8 : index
    %c0_51 = arith.constant 0 : index
    %c0_52 = arith.constant 0 : index
    %94 = vector.load %arg3[%c8, %c0_51, %c0_52] : memref<9x16x4xf32, #tpu.memory_space<vmem>>, vector<1x16x4xf32>
    %95 = vector.shape_cast %94 : vector<1x16x4xf32> to vector<16x4xf32>
    %cst_53 = arith.constant dense<0.000000e+00> : vector<16x1024xf32>
    %96 = tpu.matmul %95, %93, %cst_53 {dimension_numbers = #tpu.dot_dimension_numbers<[1], [0], [0], [1], [0, 0, 1, 1], [], []>} : vector<16x4xf32>, vector<4x1024xf32>, vector<16x1024xf32> -> vector<16x1024xf32>
    %97 = arith.addf %84, %96 : vector<16x1024xf32>
    %c0_54 = arith.constant 0 : index
    %c0_55 = arith.constant 0 : index
    %98 = vector.load %arg4[%c0_54, %c0_55] : memref<16x1xf32, #tpu.memory_space<vmem>>, vector<16x1xf32>
    %99 = vector.broadcast %98 : vector<16x1xf32> to vector<16x1024xf32>
    %100 = arith.addf %97, %99 : vector<16x1024xf32>
    %c0_56 = arith.constant 0 : index
    %c0_57 = arith.constant 0 : index
    %c0_58 = arith.constant 0 : index
    %101 = vector.load %arg5[%c0_56, %c0_57, %c0_58] : memref<1x16x1024xf32, #tpu.memory_space<vmem>>, vector<1x16x1024xf32>
    %102 = vector.shape_cast %101 : vector<1x16x1024xf32> to vector<16x1024xf32>
    %103 = vector.shape_cast %100 : vector<16x1024xf32> to vector<1x16x1024xf32>
    tpu.vector_store %arg5[%c0_56, %c0_57, %c0_58], %103 {strides = array<i32>} : memref<1x16x1024xf32, #tpu.memory_space<vmem>>, vector<1x16x1024xf32>,
    return
  }
  func.func @transform_0(%arg0: i32, %arg1: i32) -> (i32, i32, i32) {
    %c0_i32 = arith.constant 0 : i32
    %c0_i32_0 = arith.constant 0 : i32
    %c0_i32_1 = arith.constant 0 : i32
    return %arg0, %c0_i32, %c0_i32_0 : i32, i32, i32
  }
  func.func @transform_1(%arg0: i32, %arg1: i32) -> (i32, i32, i32) {
    %c0_i32 = arith.constant 0 : i32
    %c0_i32_0 = arith.constant 0 : i32
    %c0_i32_1 = arith.constant 0 : i32
    return %c0_i32, %arg1, %c0_i32_0 : i32, i32, i32
  }
  func.func @transform_2(%arg0: i32, %arg1: i32) -> (i32, i32) {
    %c0_i32 = arith.constant 0 : i32
    %c0_i32_0 = arith.constant 0 : i32
    return %arg1, %c0_i32 : i32, i32
  }
  func.func @transform_3(%arg0: i32, %arg1: i32) -> (i32, i32, i32) {
    %c0_i32 = arith.constant 0 : i32
    %c0_i32_0 = arith.constant 0 : i32
    return %arg0, %arg1, %c0_i32 : i32, i32, i32
  }
}

</mosaic_0001>

<bundles_post_ra>
// kernel: upsample_block.2
= control target key start
LH: loop header
LB: loop body
LE: loop exit
PB: predicated region body
PF: predicated region fallthrough
CT: control target
= control target key end

     0   :  { %s1267_s12 = smov 0   ;;  %s1269_s13 = smov 0   ;;  %s1495_s0 = inlined_call_operand.vmem [shape: f32[2,4,256], index: 0, kind: input, shape index: {}]   ;;  %s1496_s1 = inlined_call_operand.vmem [shape: f32[9,16,4], index: 1, kind: input, shape index: {}]   ;;  %s1497_s2 = inlined_call_operand.vmem [shape: f32[16,1], index: 2, kind: input, shape index: {}]   ;;  %s1498_s3 = inlined_call_operand.vmem [shape: f32[2,16,256], index: 3, kind: output, shape index: {}]  }
   0x1   :  { %s1271_s14 = smov 0  }
   0x2 LB: > { %s25_s15 = sadd.s32 1, %s1232_s13  ;;  %p1097_p0 = scmp.ge.s32.totalorder %s1236_s14, 1  ;;  %s1236_s14 = sphi %s1271_s14, %s13_s14   ;;  %s1232_s13 = sphi %s1269_s13, %s1508_s13   ;;  %s1228_s12 = sphi %s1267_s12, %s1507_s12  }
   0x3   : > { %p27_p1 = scmp.ge.s32.totalorder %s25_s15, 2  ;;  %p173_p2 = scmp.lt.s32.totalorder %s1236_s14, 3 }
   0x5   : > { %s1510_s15 = smov (%p27_p1, %s25_s15), 0  ;;  %p174_p3 = pnand %p1097_p0, %p173_p2 }
   0x6   : > { %p212_p4 = scmp.lt.s32.totalorder (!%p174_p3), %s1228_s12, 1  ;;  %s1238_s20 = smov (!%p174_p3), 17  }
   0x7   : > { %177 = sbr.rel (%p174_p3) target bundleno = 362 (0x16a), region = 32  ;;  %s1239_s21 = smov (!%p174_p3), 16  }
   0x8   : > { %s1240_s22 = smov (!%p174_p3), 15   ;;  %s1241_s23 = smov (!%p174_p3), 1  }
   0x9   : > { %s1242_s24 = smov (!%p174_p3), 127   ;;  %s1243_s25 = smov (!%p174_p3), 113  }
   0xa   : > { %s1244_s26 = smov (!%p174_p3), 112   ;;  %s1245_s27 = smov (!%p174_p3), 111  }
   0xc   : > { %s1512_s12 = smov (!%p212_p4, %s1228_s12), 1  ;;  %v241_v19 = vlaneseq  ;;  %vm293_vm5 = vcmask 1043456   ;;  %v1103_v42 = vld [vmem:[%s1496_s1 + $0x18] sm:$0xff]  ;;  %vm286_vm9 = vcmask 31744   ;;  %v1102_v48 = vld [vmem:[%s1496_s1 + $0x10] sm:$0xff]  ;;  %v267_v53 = vld [vmem:[%s1496_s1] sm:$0xff] }
   0xd   : > { %s1174_s16 = sshll.u32 %s1512_s12, 3  ;;  %v1116_v56 = vld [vmem:[%s1496_s1 + $0x20] sm:$0xff]  ;;  %v268_v57 = vld [vmem:[%s1496_s1 + $0x8] sm:$0xff]  ;;  %v1124_v63 = vld [vmem:[%s1496_s1 + $0x30] sm:$0xff] }
   0xe   : > { %s216_s19 = scalar_lea.vmem %s1495_s0, %s1174_s16  ;;  %v1295_v22 = vand.u32 127, %v241_v19  ;;  %v1117_v59 = vld [vmem:[%s1496_s1 + $0x28] sm:$0xff]  ;;  %v1140_v19 = vld [vmem:[%s1496_s1 + $0x50] sm:$0xff]  ;;  %v1164_v32 = vld [vmem:[%s1496_s1 + $0x80] sm:$0xff] }
   0xf   : > { %v240_v0 = vld [vmem:[%s216_s19] sm:$0xff]  ;;  %v1165_v34 = vld [vmem:[%s1496_s1 + $0x88] sm:$0xff] }
  0x10   : > { %247 = vst [vmem:[#allocation1] ss:$2 sm:$0xff] %v240_v0  ;;  %v1298_v23 = vadd.s32 128, %v1295_v22  ;;  %vm256_vm0 = vcmp.lt.s32.totalorder %v1295_v22, 17  ;;  %vm413_vm1 = vcmp.lt.s32.totalorder %v1295_v22, 15  ;;  %v244_v28 = vand.u32 15, %v1295_v22 }
  0x11   : > { %vm259_vm2 = vcmp.ge.s32.totalorder %v1295_v22, 16  ;;  %vm278_vm3 = vcmp.lt.s32.totalorder %v1295_v22, 16  ;;  %vm496_vm10 = vcmp.lt.s32.totalorder %v1295_v22, 1  ;;  %vm641_vm11 = vcmp.lt.s32.totalorder %v1295_v22, 127 }
  0x12   : > { %v245_v27 = vand.u32 15, %v1298_v23  ;;  %vm1316_vm7 = vcmp.ge.s32.totalorder %v244_v28, 1  ;;  %vm1322_vm8 = vcmp.le.s32.totalorder %v244_v28, 14  ;;  %vm720_vm12 = vcmp.lt.s32.totalorder %v1295_v22, 113  ;;  %v1141_v28 = vld [vmem:[%s1496_s1 + $0x58] sm:$0xff] }
  0x13   : > { %vm724_vm13 = vcmp.lt.s32.totalorder %v1298_v23, 240  ;;  %vm803_vm14 = vcmp.lt.s32.totalorder %v1295_v22, 112  ;;  %vm882_vm15 = vcmp.lt.s32.totalorder %v1295_v22, 111  ;;  %v1156_v23 = vld [vmem:[%s1496_s1 + $0x70] sm:$0xff] }
  0x14   : > { %vm1306_vm4 = vcmp.le.s32.totalorder %v245_v27, 14  ;;  %vm1310_vm6 = vcmp.ge.s32.totalorder %v245_v27, 1 }
  0x17   : > { %v248_v1 = vld.sshfl [vmem:[#allocation1] sm:$0xff pattern:$0x75316420]  ;;  %v249_v2 = vld.sshfl [vmem:[#allocation1 + $0x8] sm:$0xff pattern:$0x75316420] }
  0x18   : > { %252 = vrot.lane.b32.xlu1 %v248_v1, %s1238_s20  ;;  %269 = vst [vmem:[#allocation1] ss:$2 sm:$0xff] %v240_v0 }
  0x1f   : > { %v270_v3 = vld.sshfl [vmem:[#allocation1] sm:$0xff pattern:$0x75316420]  ;;  %v271_v4 = vld.sshfl [vmem:[#allocation1 + $0x8] sm:$0xff pattern:$0x75316420] }
  0x20   : > { %254 = vrot.lane.b32.xlu1 %v249_v2, %s1238_s20  ;;  %274 = vrot.lane.b32.xlu0 %v270_v3, %s1239_s21  ;;  %404 = vst [vmem:[#allocation1] ss:$2 sm:$0xff] %v240_v0  ;;  %v1132_v2 = vld [vmem:[%s1496_s1 + $0x40] sm:$0xff] }
  0x27   : > { %v405_v5 = vld.sshfl [vmem:[#allocation1] sm:$0xff pattern:$0x75316420]  ;;  %v406_v6 = vld.sshfl [vmem:[#allocation1 + $0x8] sm:$0xff pattern:$0x75316420] }
  0x28   : > { %276 = vrot.lane.b32.xlu0 %v271_v4, %s1239_s21  ;;  %487 = vst [vmem:[#allocation1] ss:$2 sm:$0xff] %v240_v0  ;;  %409 = vrot.lane.b32.xlu2 %v405_v5, %s1240_s22 }
  0x2f   : > { %v489_v7 = vld.sshfl [vmem:[#allocation1 + $0x8] sm:$0xff pattern:$0x75316420]  ;;  %v488_v8 = vld.sshfl [vmem:[#allocation1] sm:$0xff pattern:$0x75316420] }
  0x30   : > { %494 = vrot.lane.b32.xlu1 %v489_v7, %s1241_s23  ;;  %492 = vrot.lane.b32.xlu0 %v488_v8, %s1241_s23  ;;  %569 = vst [vmem:[#allocation1] ss:$2 sm:$0xff] %v240_v0  ;;  %v1125_v7 = vld [vmem:[%s1496_s1 + $0x38] sm:$0xff] }
  0x31   : > { %411 = vrot.lane.b32.xlu2 %v406_v6, %s1240_s22  ;;  %s1175_s22 = sshll.u32 %s1512_s12, 5 }
  0x37   : > { %v1291_v9 = vld.sshfl [vmem:[#allocation1] sm:$0xff pattern:$0x75316420]  ;;  %v1293_v10 = vld.sshfl [vmem:[#allocation1 + $0x8] sm:$0xff pattern:$0x75316420] }
  0x38   : > { %632 = vst [vmem:[#allocation1] ss:$2 sm:$0xff] %v240_v0 }
  0x3f   : > { %v634_v11 = vld.sshfl [vmem:[#allocation1 + $0x8] sm:$0xff pattern:$0x75316420]  ;;  %v633_v12 = vld.sshfl [vmem:[#allocation1] sm:$0xff pattern:$0x75316420] }
  0x40   : > { %639 = vrot.lane.b32.xlu0 %v634_v11, %s1242_s24  ;;  %711 = vst [vmem:[#allocation1] ss:$2 sm:$0xff] %v240_v0  ;;  %637 = vrot.lane.b32.xlu2 %v633_v12, %s1242_s24  ;;  %v1133_v11 = vld [vmem:[%s1496_s1 + $0x48] sm:$0xff]  ;;  %v954_v12 = vld [vmem:[%s1497_s2] sm:$0xff] }
  0x47   : > { %v712_v13 = vld.sshfl [vmem:[#allocation1] sm:$0xff pattern:$0x75316420]  ;;  %v713_v14 = vld.sshfl [vmem:[#allocation1 + $0x8] sm:$0xff pattern:$0x75316420] }
  0x48   : > { %716 = vrot.lane.b32.xlu1 %v712_v13, %s1243_s25  ;;  %794 = vst [vmem:[#allocation1] ss:$2 sm:$0xff] %v240_v0  ;;  %718 = vrot.lane.b32.xlu2 %v713_v14, %s1243_s25  ;;  %v955_v13 = vld [vmem:[%s1497_s2 + $0x8] sm:$0xff]  ;;  %s238_s25 = scalar_lea.vmem %s1498_s3, %s1175_s22 }
  0x4f   : > { %v796_v15 = vld.sshfl [vmem:[#allocation1 + $0x8] sm:$0xff pattern:$0x75316420]  ;;  %v795_v16 = vld.sshfl [vmem:[#allocation1] sm:$0xff pattern:$0x75316420] }
  0x50   : > { %801 = vrot.lane.b32.xlu1 %v796_v15, %s1244_s26  ;;  %799 = vrot.lane.b32.xlu0 %v795_v16, %s1244_s26  ;;  %873 = vst [vmem:[#allocation1] ss:$2 sm:$0xff] %v240_v0  ;;  %v1246_v16 = vmov 0  }
  0x51   : > { %1211 = vset.pattern.permute.xlu1 %v1246_v16  ;;  %1212 = vset.pattern.permute.xlu2 %v1246_v16 }
  0x52   : > { %1213 = vset.pattern.permute.xlu0 %v1246_v16 }
  0x57   : > { %v875_v17 = vld.sshfl [vmem:[#allocation1 + $0x8] sm:$0xff pattern:$0x75316420]  ;;  %v874_v18 = vld.sshfl [vmem:[#allocation1] sm:$0xff pattern:$0x75316420] }
  0x58   : > { %880 = vrot.lane.b32.xlu0 %v875_v17, %s1245_s27  ;;  %878 = vrot.lane.b32.xlu2 %v874_v18, %s1245_s27 }
  0x59   : > { %958 = vperm.xlu1 %1211, %v954_v12  }
  0x60   : > { %963 = vperm.xlu2 %1212, %v955_v13  }
  0x82   : > { %v410_v21 = vpop.permute.xlu2 %409 }
  0x8a   : > { %v253_v20 = vpop.permute.xlu1 %252 }
  0x8b   : > { %v412_v26 = vpop.permute.xlu2 %411 }
  0x8c   : > { %v415_v30 = vsel %vm413_vm1, %v412_v26, %v410_v21  ;;  %v414_v31 = vsel %vm413_vm1, %v410_v21, %v412_v26  ;;  %v1148_v21 = vld [vmem:[%s1496_s1 + $0x60] sm:$0xff] }
  0x8d   : > { %v416_v38 = vsel %vm259_vm2, %v415_v30, 0.0  ;;  %v421_v43 = vsel %vm1306_vm4, %v414_v31, 0.0  ;;  %v1149_v31 = vld [vmem:[%s1496_s1 + $0x68] sm:$0xff] }
  0x8e   : > { %v420_v47 = vsel %vm1322_vm8, %v416_v38, 0.0 }
  0x92   : > { %v275_v24 = vpop.permute.xlu0 %274  ;;  %v255_v25 = vpop.permute.xlu1 %254 }
  0x93   : > { %v258_v29 = vsel %vm256_vm0, %v255_v25, %v253_v20  ;;  %v257_v33 = vsel %vm256_vm0, %v253_v20, %v255_v25 }
  0x94   : > { %v261_v36 = vsel %vm259_vm2, %v258_v29, 0.0  ;;  %v266_v45 = vsel %vm1310_vm6, %v257_v33, 0.0  ;;  %v1157_v33 = vld [vmem:[%s1496_s1 + $0x78] sm:$0xff] }
  0x95   : > { %v265_v46 = vsel %vm1316_vm7, %v261_v36, 0.0 }
  0x9a   : > { %v277_v35 = vpop.permute.xlu0 %276  ;;  %v638_v58 = vpop.permute.xlu2 %637 }
  0x9b   : > { %v279_v40 = vsel %vm278_vm3, %v275_v24, %v277_v35  ;;  %v280_v41 = vsel %vm278_vm3, %v277_v35, %v275_v24 }
  0x9c   : > { %1107 = vmatpush.msk.msra.mxu1 %vm293_vm5, %v279_v40  ;;  %1177 = vmatpush.msk.msra.mxu3 %vm293_vm5, %v279_v40  ;;  %v281_v44 = vsel %vm259_vm2, %v280_v41, 0.0 }
  0x9d   : > { %1104 = vmatpush.msk.msra.mxu0 %vm293_vm5, %v281_v44  ;;  %1176 = vmatpush.msk.msra.mxu2 %vm293_vm5, %v281_v44 }
  0x9e   : > { %1109 = vmatmul.msk.f32.vlgmr.msra.gmra.mxu3 %vm286_vm9, %v1103_v42  ;;  %1121 = vmatpush.msk.msrb.mxu1 %vm293_vm5, %v421_v43 }
  0x9f   : > { %1113 = vmatpush.msk.msrb.mxu3 %vm293_vm5, %v266_v45  ;;  %1106 = vmatmul.msk.f32.vlgmr.msra.gmra.mxu2 %vm286_vm9, %v1103_v42 }
  0xa0   : > { %1110 = vmatpush.msk.msrb.mxu2 %vm293_vm5, %v265_v46  ;;  %1118 = vmatpush.msk.msrb.mxu0 %vm293_vm5, %v420_v47 }
  0xa1   : > { %1108 = vmatmul.msk.f32.vlgmr.msra.gmra.mxu1 %vm286_vm9, %v1102_v48  ;;  %1105 = vmatmul.msk.f32.vlgmr.msra.gmra.mxu0 %vm286_vm9, %v1102_v48 }
  0xa2   : > { %v495_v49 = vpop.permute.xlu1 %494  ;;  %v493_v50 = vpop.permute.xlu0 %492  ;;  %1134 = vmatpush.msk.msra.mxu0 %vm293_vm5, %v1291_v9  ;;  %1137 = vmatpush.msk.msra.mxu1 %vm293_vm5, %v1293_v10 }
  0xa3   : > { %v497_v51 = vsel %vm496_vm10, %v493_v50, %v495_v49  ;;  %v498_v52 = vsel %vm496_vm10, %v495_v49, %v493_v50  ;;  %v719_v3 = vpop.permute.xlu2 %718 }
  0xa4   : > { %v499_v54 = vsel %vm1316_vm7, %v498_v52, 0.0  ;;  %v500_v55 = vsel %vm1310_vm6, %v497_v51, 0.0 }
  0xa5   : > { %1126 = vmatpush.msk.msra.mxu2 %vm293_vm5, %v499_v54  ;;  %1129 = vmatpush.msk.msra.mxu3 %vm293_vm5, %v500_v55 }
  0xa6   : > { %1114 = vmatmul.msk.f32.vlgmr.msrb.gmra.mxu3 %vm286_vm9, %v267_v53 }
  0xa7   : > { %1111 = vmatmul.msk.f32.vlgmr.msrb.gmra.mxu2 %vm286_vm9, %v267_v53 }
  0xa9   : > { %1122 = vmatmul.msk.f32.vlgmr.msrb.gmra.mxu1 %vm286_vm9, %v1116_v56  ;;  %1119 = vmatmul.msk.f32.vlgmr.msrb.gmra.mxu0 %vm286_vm9, %v1116_v56 }
  0xae   : > { %1115 = vmatmul.msk.f32.gmra.mxu3 %vm286_vm9, %v268_v57 }
  0xaf   : > { %1112 = vmatmul.msk.f32.gmra.mxu2 %vm286_vm9, %v268_v57 }
  0xb1   : > { %1123 = vmatmul.msk.f32.gmra.mxu1 %vm286_vm9, %v1117_v59  ;;  %1120 = vmatmul.msk.f32.gmra.mxu0 %vm286_vm9, %v1117_v59 }
  0xb2   : > { %v640_v60 = vpop.permute.xlu0 %639  ;;  %v879_v24 = vpop.permute.xlu2 %878 }
  0xb3   : > { %v642_v61 = vsel %vm641_vm11, %v638_v58, %v640_v60  ;;  %v643_v62 = vsel %vm641_vm11, %v640_v60, %v638_v58 }
  0xb4   : > { %v644_v0 = vsel %vm1322_vm8, %v642_v61, 0.0  ;;  %v645_v1 = vsel %vm1306_vm4, %v643_v62, 0.0 }
  0xb5   : > { %1142 = vmatpush.msk.msrb.mxu2 %vm293_vm5, %v644_v0  ;;  %1145 = vmatpush.msk.msrb.mxu3 %vm293_vm5, %v645_v1 }
  0xb6   : > { %1130 = vmatmul.msk.f32.vlgmr.msra.gmra.mxu3 %vm286_vm9, %v1124_v63 }
  0xb7   : > { %1127 = vmatmul.msk.f32.vlgmr.msra.gmra.mxu2 %vm286_vm9, %v1124_v63 }
  0xb9   : > { %1138 = vmatmul.msk.f32.vlgmr.msra.gmra.mxu1 %vm286_vm9, %v1132_v2  ;;  %1135 = vmatmul.msk.f32.vlgmr.msra.gmra.mxu0 %vm286_vm9, %v1132_v2 }
  0xba   : > { %v717_v4 = vpop.permute.xlu1 %716 }
  0xbb   : > { %v721_v5 = vsel %vm720_vm12, %v717_v4, %v719_v3  ;;  %v722_v6 = vsel %vm720_vm12, %v719_v3, %v717_v4 }
  0xbc   : > { %v726_v8 = vsel %vm724_vm13, %v722_v6, 0.0  ;;  %v727_v9 = vsel %vm1316_vm7, %v721_v5, 0.0 }
  0xbd   : > { %v728_v10 = vsel %vm1310_vm6, %v726_v8, 0.0  ;;  %1150 = vmatpush.msk.msrb.mxu0 %vm293_vm5, %v727_v9 }
  0xbe   : > { %1131 = vmatmul.msk.f32.gmra.mxu3 %vm286_vm9, %v1125_v7  ;;  %1153 = vmatpush.msk.msrb.mxu1 %vm293_vm5, %v728_v10 }
  0xbf   : > { %1128 = vmatmul.msk.f32.gmra.mxu2 %vm286_vm9, %v1125_v7 }
  0xc1   : > { %1139 = vmatmul.msk.f32.gmra.mxu1 %vm286_vm9, %v1133_v11  ;;  %1136 = vmatmul.msk.f32.gmra.mxu0 %vm286_vm9, %v1133_v11 }
  0xc2   : > { %v802_v14 = vpop.permute.xlu1 %801  ;;  %v800_v15 = vpop.permute.xlu0 %799 }
  0xc3   : > { %v804_v17 = vsel %vm803_vm14, %v800_v15, %v802_v14  ;;  %v805_v18 = vsel %vm803_vm14, %v802_v14, %v800_v15 }
  0xc4   : > { %v807_v20 = vsel %vm724_vm13, %v805_v18, 0.0  ;;  %1158 = vmatpush.msk.msra.mxu2 %vm293_vm5, %v804_v17 }
  0xc5   : > { %1161 = vmatpush.msk.msra.mxu3 %vm293_vm5, %v807_v20 }
  0xc6   : > { %1146 = vmatmul.msk.f32.vlgmr.msrb.gmra.mxu3 %vm286_vm9, %v1140_v19 }
  0xc7   : > { %1143 = vmatmul.msk.f32.vlgmr.msrb.gmra.mxu2 %vm286_vm9, %v1140_v19 }
  0xc9   : > { %1154 = vmatmul.msk.f32.vlgmr.msrb.gmra.mxu1 %vm286_vm9, %v1148_v21  ;;  %1151 = vmatmul.msk.f32.vlgmr.msrb.gmra.mxu0 %vm286_vm9, %v1148_v21 }
  0xca   : > { %v881_v25 = vpop.permute.xlu0 %880 }
  0xcb   : > { %v883_v26 = vsel %vm882_vm15, %v879_v24, %v881_v25  ;;  %v884_v27 = vsel %vm882_vm15, %v881_v25, %v879_v24 }
  0xcc   : > { %v886_v29 = vsel %vm724_vm13, %v884_v27, 0.0  ;;  %v887_v30 = vsel %vm1322_vm8, %v883_v26, 0.0  ;;  %v959_v27 = vpop.permute.xlu1 %958 }
  0xcd   : > { %v888_v22 = vsel %vm1306_vm4, %v886_v29, 0.0  ;;  %1166 = vmatpush.msk.msra.mxu0 %vm293_vm5, %v887_v30 }
  0xce   : > { %1147 = vmatmul.msk.f32.gmra.mxu3 %vm286_vm9, %v1141_v28  ;;  %1169 = vmatpush.msk.msra.mxu1 %vm293_vm5, %v888_v22 }
  0xcf   : > { %1144 = vmatmul.msk.f32.gmra.mxu2 %vm286_vm9, %v1141_v28 }
  0xd1   : > { %1155 = vmatmul.msk.f32.gmra.mxu1 %vm286_vm9, %v1149_v31  ;;  %1152 = vmatmul.msk.f32.gmra.mxu0 %vm286_vm9, %v1149_v31 }
  0xd6   : > { %1162 = vmatmul.msk.f32.vlgmr.msra.gmra.mxu3 %vm286_vm9, %v1156_v23 }
  0xd7   : > { %1159 = vmatmul.msk.f32.vlgmr.msra.gmra.mxu2 %vm286_vm9, %v1156_v23 }
  0xd9   : > { %1170 = vmatmul.msk.f32.vlgmr.msra.gmra.mxu1 %vm286_vm9, %v1164_v32  ;;  %1167 = vmatmul.msk.f32.vlgmr.msra.gmra.mxu0 %vm286_vm9, %v1164_v32 }
  0xde   : > { %1163 = vmatmul.msk.f32.gmra.mxu3 %vm286_vm9, %v1157_v33 }
  0xdf   : > { %1160 = vmatmul.msk.f32.gmra.mxu2 %vm286_vm9, %v1157_v33 }
  0xe1   : > { %1171 = vmatmul.msk.f32.gmra.mxu1 %vm286_vm9, %v1165_v34  ;;  %1168 = vmatmul.msk.f32.gmra.mxu0 %vm286_vm9, %v1165_v34 }
 0x11e   : > { %v340_v35 = vpop.f32.mrf.mxu1  ;;  %v317_v36 = vpop.f32.mrf.mxu0 }
 0x121   : > { %v343_v37 = vpop.f32.mrf.mxu3 }
 0x122   : > { %v320_v38 = vpop.f32.mrf.mxu2 }
 0x126   : > { %v477_v39 = vpop.f32.mrf.mxu1  ;;  %v454_v40 = vpop.f32.mrf.mxu0 }
 0x129   : > { %v398_v41 = vpop.f32.mrf.mxu3 }
 0x12a   : > { %v375_v42 = vpop.f32.mrf.mxu2  ;;  %v399_v57 = vadd.f32 %v398_v41, %v340_v35 }
 0x12b   : > { %v376_v58 = vadd.f32 %v375_v42, %v317_v36 }
 0x12c   : > { %v484_v61 = vadd.f32 %v477_v39, %v399_v57 }
 0x12d   : > { %v483_v62 = vadd.f32 %v454_v40, %v376_v58  ;;  %v964_v40 = vpop.permute.xlu2 %963 }
 0x12e   : > { %v480_v43 = vpop.f32.mrf.mxu1  ;;  %v457_v44 = vpop.f32.mrf.mxu0 }
 0x131   : > { %v401_v45 = vpop.f32.mrf.mxu3 }
 0x132   : > { %v378_v46 = vpop.f32.mrf.mxu2  ;;  %v402_v3 = vadd.f32 %v401_v45, %v343_v37 }
 0x133   : > { %v379_v4 = vadd.f32 %v378_v46, %v320_v38 }
 0x134   : > { %v486_v9 = vadd.f32 %v480_v43, %v402_v3 }
 0x135   : > { %v485_v11 = vadd.f32 %v457_v44, %v379_v4 }
 0x136   : > { %v622_v47 = vpop.f32.mrf.mxu1  ;;  %v599_v48 = vpop.f32.mrf.mxu0 }
 0x139   : > { %v556_v49 = vpop.f32.mrf.mxu3 }
 0x13a   : > { %v533_v50 = vpop.f32.mrf.mxu2  ;;  %v563_v63 = vadd.f32 %v556_v49, %v484_v61 }
 0x13b   : > { %v562_v2 = vadd.f32 %v533_v50, %v483_v62 }
 0x13c   : > { %v629_v6 = vadd.f32 %v622_v47, %v563_v63 }
 0x13d   : > { %v628_v8 = vadd.f32 %v599_v48, %v562_v2 }
 0x13e   : > { %v625_v51 = vpop.f32.mrf.mxu1  ;;  %v602_v52 = vpop.f32.mrf.mxu0 }
 0x141   : > { %v559_v53 = vpop.f32.mrf.mxu3 }
 0x142   : > { %v536_v54 = vpop.f32.mrf.mxu2  ;;  %v565_v13 = vadd.f32 %v559_v53, %v486_v9 }
 0x143   : > { %v564_v14 = vadd.f32 %v536_v54, %v485_v11 }
 0x144   : > { %v631_v20 = vadd.f32 %v625_v51, %v565_v13 }
 0x145   : > { %v630_v25 = vadd.f32 %v602_v52, %v564_v14 }
 0x146   : > { %v784_v55 = vpop.f32.mrf.mxu1  ;;  %v761_v56 = vpop.f32.mrf.mxu0 }
 0x149   : > { %v701_v59 = vpop.f32.mrf.mxu3 }
 0x14a   : > { %v678_v60 = vpop.f32.mrf.mxu2  ;;  %v708_v10 = vadd.f32 %v701_v59, %v629_v6 }
 0x14b   : > { %v707_v12 = vadd.f32 %v678_v60, %v628_v8 }
 0x14c   : > { %v791_v16 = vadd.f32 %v784_v55, %v708_v10 }
 0x14d   : > { %v790_v18 = vadd.f32 %v761_v56, %v707_v12 }
 0x14e   : > { %v787_v0 = vpop.f32.mrf.mxu1  ;;  %v764_v1 = vpop.f32.mrf.mxu0 }
 0x151   : > { %v704_v5 = vpop.f32.mrf.mxu3 }
 0x152   : > { %v681_v7 = vpop.f32.mrf.mxu2  ;;  %v710_v28 = vadd.f32 %v704_v5, %v631_v20 }
 0x153   : > { %v709_v30 = vadd.f32 %v681_v7, %v630_v25 }
 0x154   : > { %v793_v32 = vadd.f32 %v787_v0, %v710_v28 }
 0x155   : > { %v792_v33 = vadd.f32 %v764_v1, %v709_v30 }
 0x156   : > { %v944_v15 = vpop.f32.mrf.mxu1  ;;  %v921_v17 = vpop.f32.mrf.mxu0 }
 0x159   : > { %v863_v19 = vpop.f32.mrf.mxu3 }
 0x15a   : > { %v870_v21 = vadd.f32 %v863_v19, %v791_v16  ;;  %v840_v24 = vpop.f32.mrf.mxu2 }
 0x15b   : > { %v869_v26 = vadd.f32 %v840_v24, %v790_v18 }
 0x15c   : > { %v951_v29 = vadd.f32 %v944_v15, %v870_v21 }
 0x15d   : > { %v950_v22 = vadd.f32 %v921_v17, %v869_v26 }
 0x15e   : > { %v967_v31 = vadd.f32 %v959_v27, %v951_v29  ;;  %v947_v35 = vpop.f32.mrf.mxu1  ;;  %v924_v38 = vpop.f32.mrf.mxu0 }
 0x15f   : > { %v966_v23 = vadd.f32 %v959_v27, %v950_v22 }
 0x160   : > { %971 = vst [vmem:[%s238_s25 + $0x8] sm:$0xff] %v967_v31 }
 0x161   : > { %970 = vst [vmem:[%s238_s25] sm:$0xff] %v966_v23  ;;  %v866_v34 = vpop.f32.mrf.mxu3 }
 0x162   : > { %v872_v36 = vadd.f32 %v866_v34, %v793_v32  ;;  %v843_v37 = vpop.f32.mrf.mxu2 }
 0x163   : > { %v871_v39 = vadd.f32 %v843_v37, %v792_v33 }
 0x164   : > { %v953_v41 = vadd.f32 %v947_v35, %v872_v36 }
 0x165   : > { %v952_v42 = vadd.f32 %v924_v38, %v871_v39 }
 0x166   : > { %v969_v43 = vadd.f32 %v964_v40, %v953_v41 }
 0x167   : > { %v968_v44 = vadd.f32 %v964_v40, %v952_v42 }
 0x168   : > { %973 = vst [vmem:[%s238_s25 + $0x18] sm:$0xff] %v969_v43 }
 0x169   : > { %972 = vst [vmem:[%s238_s25 + $0x10] sm:$0xff] %v968_v44 }
 0x16a PF: > { %s13_s14 = sadd.s32 1, %s1236_s14   ;;  %s1507_s12 = smov %s1232_s13 }
 0x16b   : > { %p10_p5 = scmp.ge.s32.totalorder %s13_s14, 4   ;;  %s1508_s13 = smov %s1510_s15 }
 0x16d   :  { %12 = sbr.rel (!%p10_p5) target bundleno = 2 (0x2), region = 76 }

// kernel: upsample_block.3
= control target key start
LH: loop header
LB: loop body
LE: loop exit
PB: predicated region body
PF: predicated region fallthrough
CT: control target
= control target key end

     0   :  { %s3347_s12 = smov 0   ;;  %s3349_s13 = smov 0   ;;  %s4494_s0 = inlined_call_operand.vmem [shape: f32[2,4,1024], index: 0, kind: input, shape index: {}]   ;;  %s4495_s1 = inlined_call_operand.vmem [shape: f32[9,16,4], index: 1, kind: input, shape index: {}]   ;;  %s4496_s2 = inlined_call_operand.vmem [shape: f32[16,1], index: 2, kind: input, shape index: {}]   ;;  %s4497_s3 = inlined_call_operand.vmem [shape: f32[2,16,1024], index: 3, kind: output, shape index: {}]  }
   0x1   :  { %s3351_s14 = smov 0  }
   0x2 LB: > { %s25_s15 = sadd.s32 1, %s3312_s13  ;;  %p3017_p0 = scmp.ge.s32.totalorder %s3316_s14, 1  ;;  %s3316_s14 = sphi %s3351_s14, %s13_s14   ;;  %s3312_s13 = sphi %s3349_s13, %s4727_s13   ;;  %s3308_s12 = sphi %s3347_s12, %s4726_s12  }
   0x3   : > { %p27_p1 = scmp.ge.s32.totalorder %s25_s15, 2  ;;  %p173_p2 = scmp.lt.s32.totalorder %s3316_s14, 3 }
   0x5   : > { %s4729_s15 = smov (%p27_p1, %s25_s15), 0  ;;  %p174_p3 = pnand %p3017_p0, %p173_p2 }
   0x6   : > { %p212_p4 = scmp.lt.s32.totalorder (!%p174_p3), %s3308_s12, 1  ;;  %s3318_s20 = smov (!%p174_p3), 32  }
   0x7   : > { %177 = sbr.rel (%p174_p3) target bundleno = 577 (0x241), region = 32  ;;  %s3319_s21 = smov (!%p174_p3), 33  }
   0x8   : > { %s3320_s22 = smov (!%p174_p3), 31   ;;  %s3321_s23 = smov (!%p174_p3), 1  }
   0x9   : > { %s3322_s24 = smov (!%p174_p3), 127   ;;  %s3323_s4 = smov (!%p174_p3), 97  }
   0xa   : > { %s3324_s7 = smov (!%p174_p3), 96  }
   0xc   : > { %s4731_s12 = smov (!%p212_p4, %s3308_s12), 1  ;;  %v244_v44 = vlaneseq  ;;  %vm4498_vm1 = vcmask 1043456   ;;  %v3429_v54 = vld [vmem:[%s4495_s1 + $0x10] sm:$0xff]  ;;  %vm4499_vm3 = vcmask 31744  }
   0xd   : > { %s3256_s16 = sshll.u32 %s4731_s12, 5 }
   0xe   : > { %s216_s19 = scalar_lea.vmem %s4494_s0, %s3256_s16  ;;  %v3420_v50 = vand.u32 127, %v244_v44  ;;  %s3325_s16 = smov 95  }
   0xf   : > { %v3371_v0 = vld [vmem:[%s216_s19 + $0x8] sm:$0xff]  ;;  %v3373_v1 = vld [vmem:[%s216_s19] sm:$0xff]  ;;  %v3375_v2 = vld [vmem:[%s216_s19 + $0x18] sm:$0xff] }
  0x10   : > { %267 = vst [vmem:[#allocation1 + $0x10] ss:$2 sm:$0xff] %v3371_v0  ;;  %v3378_v3 = vld [vmem:[%s216_s19 + $0x10] sm:$0xff]  ;;  %vm386_vm0 = vcmp.lt.s32.totalorder %v3420_v50, 32  ;;  %vm313_vm2 = vcmp.ge.s32.totalorder %v3420_v50, 32  ;;  %v3432_v55 = vadd.s32 128, %v3420_v50 }
  0x11   : > { %265 = vst [vmem:[#allocation1] ss:$2 sm:$0xff] %v3373_v1  ;;  %vm304_vm4 = vcmp.lt.s32.totalorder %v3420_v50, 33  ;;  %vm875_vm11 = vcmp.lt.s32.totalorder %v3420_v50, 31 }
  0x12   : > { %271 = vst [vmem:[#allocation1 + $0x30] ss:$2 sm:$0xff] %v3375_v2  ;;  %v254_v62 = vand.u32 31, %v3432_v55  ;;  %v4540_v55 = vmov 0 }
  0x13   : > { %269 = vst [vmem:[#allocation1 + $0x20] ss:$2 sm:$0xff] %v3378_v3 }
  0x14   : > { %vm3469_vm5 = vcmp.ge.s32.totalorder %v254_v62, 1  ;;  %vm3655_vm15 = vcmp.le.s32.totalorder %v254_v62, 30 }
  0x17   : > { %v274_v4 = vld.sshfl [vmem:[#allocation1 + $0x10] sm:$0xff pattern:$0x75316420]  ;;  %v275_v5 = vld.sshfl [vmem:[#allocation1 + $0x18] sm:$0xff pattern:$0x75316420] }
  0x18   : > { %349 = vst [vmem:[#allocation1 + $0x10] ss:$2 sm:$0xff] %v3371_v0  ;;  %v272_v6 = vld.sshfl [vmem:[#allocation1] sm:$0xff pattern:$0x75316420] }
  0x19   : > { %v273_v7 = vld.sshfl [vmem:[#allocation1 + $0x8] sm:$0xff pattern:$0x75316420]  ;;  %v278_v8 = vld.sshfl [vmem:[#allocation1 + $0x30] sm:$0xff pattern:$0x75316420] }
  0x1a   : > { %347 = vst [vmem:[#allocation1] ss:$2 sm:$0xff] %v3373_v1  ;;  %v279_v9 = vld.sshfl [vmem:[#allocation1 + $0x38] sm:$0xff pattern:$0x75316420] }
  0x1b   : > { %353 = vst [vmem:[#allocation1 + $0x30] ss:$2 sm:$0xff] %v3375_v2  ;;  %v276_v10 = vld.sshfl [vmem:[#allocation1 + $0x20] sm:$0xff pattern:$0x75316420] }
  0x1c   : > { %v277_v11 = vld.sshfl [vmem:[#allocation1 + $0x28] sm:$0xff pattern:$0x75316420] }
  0x1d   : > { %351 = vst [vmem:[#allocation1 + $0x20] ss:$2 sm:$0xff] %v3378_v3 }
  0x1f   : > { %v357_v12 = vld.sshfl [vmem:[#allocation1 + $0x18] sm:$0xff pattern:$0x75316420]  ;;  %v356_v13 = vld.sshfl [vmem:[#allocation1 + $0x10] sm:$0xff pattern:$0x75316420] }
  0x20   : > { %376 = vrot.lane.b32.xlu1 %v357_v12, %s3318_s20  ;;  %838 = vst [vmem:[#allocation1 + $0x10] ss:$2 sm:$0xff] %v3371_v0  ;;  %v3483_v12 = vadd.s32 256, %v3420_v50 }
  0x21   : > { %v355_v14 = vld.sshfl [vmem:[#allocation1 + $0x8] sm:$0xff pattern:$0x75316420]  ;;  %v354_v15 = vld.sshfl [vmem:[#allocation1] sm:$0xff pattern:$0x75316420] }
  0x22   : > { %372 = vrot.lane.b32.xlu0 %v355_v14, %s3318_s20  ;;  %836 = vst [vmem:[#allocation1] ss:$2 sm:$0xff] %v3373_v1  ;;  %v360_v16 = vld.sshfl [vmem:[#allocation1 + $0x30] sm:$0xff pattern:$0x75316420] }
  0x23   : > { %v361_v17 = vld.sshfl [vmem:[#allocation1 + $0x38] sm:$0xff pattern:$0x75316420] }
  0x24   : > { %384 = vrot.lane.b32.xlu2 %v361_v17, %s3318_s20  ;;  %842 = vst [vmem:[#allocation1 + $0x30] ss:$2 sm:$0xff] %v3375_v2  ;;  %v358_v18 = vld.sshfl [vmem:[#allocation1 + $0x20] sm:$0xff pattern:$0x75316420] }
  0x25   : > { %v359_v19 = vld.sshfl [vmem:[#allocation1 + $0x28] sm:$0xff pattern:$0x75316420] }
  0x26   : > { %840 = vst [vmem:[#allocation1 + $0x20] ss:$2 sm:$0xff] %v3378_v3 }
  0x27   : > { %v846_v22 = vld.sshfl [vmem:[#allocation1 + $0x18] sm:$0xff pattern:$0x75316420]  ;;  %v845_v23 = vld.sshfl [vmem:[#allocation1 + $0x10] sm:$0xff pattern:$0x75316420] }
  0x28   : > { %370 = vrot.lane.b32.xlu1 %v354_v15, %s3318_s20  ;;  %1143 = vst [vmem:[#allocation1 + $0x10] ss:$2 sm:$0xff] %v3371_v0 }
  0x29   : > { %v844_v20 = vld.sshfl [vmem:[#allocation1 + $0x8] sm:$0xff pattern:$0x75316420]  ;;  %v843_v21 = vld.sshfl [vmem:[#allocation1] sm:$0xff pattern:$0x75316420] }
  0x2a   : > { %374 = vrot.lane.b32.xlu0 %v356_v13, %s3318_s20  ;;  %1141 = vst [vmem:[#allocation1] ss:$2 sm:$0xff] %v3373_v1  ;;  %v3486_v13 = vadd.s32 384, %v3420_v50 }
  0x2b   : > { %v849_v24 = vld.sshfl [vmem:[#allocation1 + $0x30] sm:$0xff pattern:$0x75316420]  ;;  %v850_v25 = vld.sshfl [vmem:[#allocation1 + $0x38] sm:$0xff pattern:$0x75316420] }
  0x2c   : > { %380 = vrot.lane.b32.xlu2 %v359_v19, %s3318_s20  ;;  %1147 = vst [vmem:[#allocation1 + $0x30] ss:$2 sm:$0xff] %v3375_v2  ;;  %v256_v19 = vand.u32 31, %v3486_v13 }
  0x2d   : > { %v848_v26 = vld.sshfl [vmem:[#allocation1 + $0x28] sm:$0xff pattern:$0x75316420]  ;;  %v847_v27 = vld.sshfl [vmem:[#allocation1 + $0x20] sm:$0xff pattern:$0x75316420] }
  0x2e   : > { %1145 = vst [vmem:[#allocation1 + $0x20] ss:$2 sm:$0xff] %v3378_v3  ;;  %vm3523_vm7 = vcmp.ge.s32.totalorder %v256_v19, 1 }
  0x2f   : > { %v1150_v36 = vld.sshfl [vmem:[#allocation1 + $0x10] sm:$0xff pattern:$0x75316420]  ;;  %v1151_v38 = vld.sshfl [vmem:[#allocation1 + $0x18] sm:$0xff pattern:$0x75316420] }
  0x30   : > { %378 = vrot.lane.b32.xlu1 %v358_v18, %s3318_s20  ;;  %1435 = vst [vmem:[#allocation1 + $0x10] ss:$2 sm:$0xff] %v3371_v0  ;;  %v255_v18 = vand.u32 31, %v3483_v12 }
  0x31   : > { %v1149_v28 = vld.sshfl [vmem:[#allocation1 + $0x8] sm:$0xff pattern:$0x75316420]  ;;  %v1148_v29 = vld.sshfl [vmem:[#allocation1] sm:$0xff pattern:$0x75316420] }
  0x32   : > { %382 = vrot.lane.b32.xlu0 %v360_v16, %s3318_s20  ;;  %1433 = vst [vmem:[#allocation1] ss:$2 sm:$0xff] %v3373_v1  ;;  %vm3517_vm6 = vcmp.ge.s32.totalorder %v255_v18, 1  ;;  %vm3626_vm14 = vcmp.le.s32.totalorder %v255_v18, 30 }
  0x33   : > { %v1155_v30 = vld.sshfl [vmem:[#allocation1 + $0x38] sm:$0xff pattern:$0x75316420]  ;;  %v1154_v33 = vld.sshfl [vmem:[#allocation1 + $0x30] sm:$0xff pattern:$0x75316420] }
  0x34   : > { %290 = vrot.lane.b32.xlu2 %v273_v7, %s3319_s21  ;;  %1439 = vst [vmem:[#allocation1 + $0x30] ss:$2 sm:$0xff] %v3375_v2  ;;  %v3465_v7 = vld [vmem:[%s4495_s1 + $0x18] sm:$0xff] }
  0x35   : > { %v1152_v37 = vld.sshfl [vmem:[#allocation1 + $0x20] sm:$0xff pattern:$0x75316420]  ;;  %v1153_v42 = vld.sshfl [vmem:[#allocation1 + $0x28] sm:$0xff pattern:$0x75316420] }
  0x36   : > { %1437 = vst [vmem:[#allocation1 + $0x20] ss:$2 sm:$0xff] %v3378_v3 }
  0x37   : > { %v3408_v39 = vld.sshfl [vmem:[#allocation1 + $0x10] sm:$0xff pattern:$0x75316420]  ;;  %v3410_v40 = vld.sshfl [vmem:[#allocation1 + $0x18] sm:$0xff pattern:$0x75316420] }
  0x38   : > { %294 = vrot.lane.b32.xlu1 %v275_v5, %s3319_s21  ;;  %1672 = vst [vmem:[#allocation1 + $0x10] ss:$2 sm:$0xff] %v3371_v0 }
  0x39   : > { %v3396_v31 = vld.sshfl [vmem:[#allocation1] sm:$0xff pattern:$0x75316420]  ;;  %v3398_v32 = vld.sshfl [vmem:[#allocation1 + $0x8] sm:$0xff pattern:$0x75316420] }
  0x3a   : > { %292 = vrot.lane.b32.xlu0 %v274_v4, %s3319_s21  ;;  %1670 = vst [vmem:[#allocation1] ss:$2 sm:$0xff] %v3373_v1 }
  0x3b   : > { %v3402_v34 = vld.sshfl [vmem:[#allocation1 + $0x30] sm:$0xff pattern:$0x75316420]  ;;  %v3404_v35 = vld.sshfl [vmem:[#allocation1 + $0x38] sm:$0xff pattern:$0x75316420] }
  0x3c   : > { %288 = vrot.lane.b32.xlu2 %v272_v6, %s3319_s21  ;;  %1676 = vst [vmem:[#allocation1 + $0x30] ss:$2 sm:$0xff] %v3375_v2 }
  0x3d   : > { %v3414_v45 = vld.sshfl [vmem:[#allocation1 + $0x20] sm:$0xff pattern:$0x75316420]  ;;  %v3416_v46 = vld.sshfl [vmem:[#allocation1 + $0x28] sm:$0xff pattern:$0x75316420] }
  0x3e   : > { %1674 = vst [vmem:[#allocation1 + $0x20] ss:$2 sm:$0xff] %v3378_v3 }
  0x3f   : > { %v1680_v48 = vld.sshfl [vmem:[#allocation1 + $0x18] sm:$0xff pattern:$0x75316420] }
  0x40   : > { %298 = vrot.lane.b32.xlu1 %v277_v11, %s3319_s21 }
  0x41   : > { %v1678_v52 = vld.sshfl [vmem:[#allocation1 + $0x8] sm:$0xff pattern:$0x75316420] }
  0x42   : > { %302 = vrot.lane.b32.xlu0 %v279_v9, %s3319_s21 }
  0x44   : > { %300 = vrot.lane.b32.xlu2 %v278_v8, %s3319_s21 }
  0x45   : > { %v1681_v4 = vld.sshfl [vmem:[#allocation1 + $0x20] sm:$0xff pattern:$0x75316420]  ;;  %v1682_v5 = vld.sshfl [vmem:[#allocation1 + $0x28] sm:$0xff pattern:$0x75316420] }
  0x46   : > { %1963 = vst [vmem:[#allocation1 + $0x20] ss:$2 sm:$0xff] %v3378_v3 }
  0x48   : > { %861 = vrot.lane.b32.xlu1 %v844_v20, %s3320_s22  ;;  %v3511_v20 = vadd.s32 768, %v3420_v50 }
  0x4a   : > { %296 = vrot.lane.b32.xlu0 %v276_v10, %s3319_s21 }
  0x4c   : > { %863 = vrot.lane.b32.xlu2 %v845_v23, %s3320_s22 }
  0x50   : > { %859 = vrot.lane.b32.xlu1 %v843_v21, %s3320_s22  ;;  %v1679_v21 = vld.sshfl [vmem:[#allocation1 + $0x10] sm:$0xff pattern:$0x75316420] }
  0x51   : > { %1961 = vst [vmem:[#allocation1 + $0x10] ss:$2 sm:$0xff] %v3371_v0 }
  0x52   : > { %865 = vrot.lane.b32.xlu0 %v846_v22, %s3320_s22 }
  0x54   : > { %873 = vrot.lane.b32.xlu2 %v850_v25, %s3320_s22  ;;  %v3528_v25 = vadd.s32 896, %v3420_v50 }
  0x58   : > { %871 = vrot.lane.b32.xlu1 %v849_v24, %s3320_s22 }
  0x5a   : > { %869 = vrot.lane.b32.xlu0 %v848_v26, %s3320_s22 }
  0x5c   : > { %867 = vrot.lane.b32.xlu2 %v847_v27, %s3320_s22  ;;  %s3257_s22 = sshll.u32 %s4731_s12, 7 }
  0x5d   : > { %s4422_s25 = scalar_lea.vmem %s4497_s3, %s3257_s22 }
  0x60   : > { %1168 = vrot.lane.b32.xlu1 %v1150_v36, %s3321_s23 }
  0x62   : > { %1166 = vrot.lane.b32.xlu0 %v1149_v28, %s3321_s23 }
  0x64   : > { %1170 = vrot.lane.b32.xlu2 %v1151_v38, %s3321_s23  ;;  %v253_v38 = vand.u32 31, %v3420_v50 }
  0x66   : > { %vm3573_vm10 = vcmp.ge.s32.totalorder %v253_v38, 1 }
  0x68   : > { %1178 = vrot.lane.b32.xlu1 %v1155_v30, %s3321_s23  ;;  %v259_v30 = vand.u32 31, %v3511_v20 }
  0x6a   : > { %1164 = vrot.lane.b32.xlu0 %v1148_v29, %s3321_s23  ;;  %vm3554_vm8 = vcmp.ge.s32.totalorder %v259_v30, 1 }
  0x6c   : > { %1174 = vrot.lane.b32.xlu2 %v1153_v42, %s3321_s23  ;;  %v1683_v42 = vld.sshfl [vmem:[#allocation1 + $0x30] sm:$0xff pattern:$0x75316420] }
  0x70   : > { %1172 = vrot.lane.b32.xlu1 %v1152_v37, %s3321_s23  ;;  %v260_v37 = vand.u32 31, %v3528_v25 }
  0x72   : > { %1176 = vrot.lane.b32.xlu0 %v1154_v33, %s3321_s23  ;;  %vm3561_vm9 = vcmp.ge.s32.totalorder %v260_v37, 1 }
  0x74   : > { %1697 = vrot.lane.b32.xlu2 %v1679_v21, %s3322_s24 }
  0x78   : > { %1701 = vrot.lane.b32.xlu1 %v1681_v4, %s3322_s24  ;;  %v1677_v4 = vld.sshfl [vmem:[#allocation1] sm:$0xff pattern:$0x75316420] }
  0x79   : > { %1959 = vst [vmem:[#allocation1] ss:$2 sm:$0xff] %v3373_v1 }
  0x7a   : > { %1699 = vrot.lane.b32.xlu0 %v1680_v48, %s3322_s24  ;;  %v3569_v48 = vadd.s32 640, %v3420_v50 }
  0x7c   : > { %1693 = vrot.lane.b32.xlu2 %v1677_v4, %s3322_s24 }
  0x7e   : > { %v385_v41 = vpop.permute.xlu2 %384 }
  0x80   : > { %1705 = vrot.lane.b32.xlu1 %v1683_v42, %s3322_s24 }
  0x82   : > { %1695 = vrot.lane.b32.xlu0 %v1678_v52, %s3322_s24 }
  0x86   : > { %v381_v43 = vpop.permute.xlu2 %380 }
  0x8a   : > { %1703 = vrot.lane.b32.xlu0 %v1682_v5, %s3322_s24  ;;  %v1968_v5 = vld.sshfl [vmem:[#allocation1 + $0x10] sm:$0xff pattern:$0x75316420] }
  0x8b   : > { %1986 = vrot.lane.b32.xlu1 %v1968_v5, %s3323_s4  ;;  %v4544_v5 = vmov 0 }
  0x8e   : > { %v3422_v51 = vpop.permute.xlu2 %290 }
  0x92   : > { %v377_v47 = vpop.permute.xlu1 %376 }
  0x94   : > { %v373_v49 = vpop.permute.xlu0 %372 }
  0x96   : > { %v3457_v63 = vpop.permute.xlu2 %288 }
  0x97   : > { %v311_v9 = vsel %vm304_vm4, %v3457_v63, %v3422_v51 }
  0x98   : > { %v338_v17 = vsel %vm3469_vm5, %v311_v9, 0.0 }
  0x9a   : > { %v371_v53 = vpop.permute.xlu1 %370 }
  0x9b   : > { %v393_v56 = vsel %vm386_vm0, %v371_v53, %v373_v49  ;;  %v394_v57 = vsel %vm386_vm0, %v385_v41, %v371_v53 }
  0x9c   : > { %v375_v58 = vpop.permute.xlu0 %374  ;;  %3027 = vmatpush.msk.msra.mxu1 %vm4498_vm1, %v393_v56  ;;  %v395_v59 = vsel %vm313_vm2, %v394_v57, 0.0 }
  0x9d   : > { %v392_v60 = vsel %vm386_vm0, %v373_v49, %v375_v58  ;;  %v391_v61 = vsel %vm386_vm0, %v375_v58, %v377_v47  ;;  %3024 = vmatpush.msk.msra.mxu0 %vm4498_vm1, %v395_v59  ;;  %3028 = vmatmul.msk.f32.vlgmr.msra.gmra.mxu1 %vm4499_vm3, %v3429_v54 }
  0x9e   : > { %3030 = vmatpush.msk.msra.mxu2 %vm4498_vm1, %v392_v60  ;;  %3033 = vmatpush.msk.msra.mxu3 %vm4498_vm1, %v391_v61  ;;  %v301_v29 = vpop.permute.xlu2 %300 }
  0x9f   : > { %3031 = vmatmul.msk.f32.vlgmr.msra.gmra.mxu2 %vm4499_vm3, %v3429_v54  ;;  %3034 = vmatmul.msk.f32.vlgmr.msra.gmra.mxu3 %vm4499_vm3, %v3429_v54 }
  0xa0   : > { %3025 = vmatmul.msk.f32.vlgmr.msra.gmra.mxu0 %vm4499_vm3, %v3429_v54 }
  0xa2   : > { %v379_v6 = vpop.permute.xlu1 %378 }
  0xa3   : > { %v390_v10 = vsel %vm386_vm0, %v377_v47, %v379_v6  ;;  %v389_v11 = vsel %vm386_vm0, %v379_v6, %v381_v43  ;;  %v3566_v47 = vadd.s32 512, %v3420_v50  ;;  %v3609_v6 = vld [vmem:[%s4495_s1] sm:$0xff] }
  0xa4   : > { %v383_v14 = vpop.permute.xlu0 %382  ;;  %3036 = vmatpush.msk.msrb.mxu0 %vm4498_vm1, %v390_v10  ;;  %3039 = vmatpush.msk.msrb.mxu1 %vm4498_vm1, %v389_v11  ;;  %v4534_v11 = vmov 0 }
  0xa5   : > { %v388_v15 = vsel %vm386_vm0, %v381_v43, %v383_v14  ;;  %v387_v16 = vsel %vm386_vm0, %v383_v14, %v385_v41  ;;  %3029 = vmatmul.msk.f32.gmra.mxu1 %vm4499_vm3, %v3465_v7  ;;  %v4524_v41 = vmov 0  ;;  %v257_v61 = vand.u32 31, %v3566_v47 }
  0xa6   : > { %3042 = vmatpush.msk.msrb.mxu2 %vm4498_vm1, %v388_v15  ;;  %3045 = vmatpush.msk.msrb.mxu3 %vm4498_vm1, %v387_v16  ;;  %v4525_v41 = vsel %vm3554_vm8, 4294967295, %v4524_v41  ;;  %v864_v57 = vpop.permute.xlu2 %863  ;;  %v4535_v11 = vsel %vm3626_vm14, 4294967295, %v4534_v11  ;;  %vm3665_vm0 = vcmp.le.s32.totalorder %v253_v38, 30 }
  0xa7   : > { %3032 = vmatmul.msk.f32.gmra.mxu2 %vm4499_vm3, %v3465_v7  ;;  %3035 = vmatmul.msk.f32.gmra.mxu3 %vm4499_vm3, %v3465_v7  ;;  %vm3614_vm12 = vcmp.ge.s32.totalorder %v257_v61, 1 }
  0xa8   : > { %3026 = vmatmul.msk.f32.gmra.mxu0 %vm4499_vm3, %v3465_v7  ;;  %3051 = vmatpush.msk.msra.mxu1 %vm4498_vm1, %v338_v17 }
  0xaa   : > { %v295_v22 = vpop.permute.xlu1 %294 }
  0xac   : > { %v293_v26 = vpop.permute.xlu0 %292 }
  0xad   : > { %v310_v27 = vsel %vm304_vm4, %v3422_v51, %v293_v26  ;;  %3040 = vmatmul.msk.f32.vlgmr.msrb.gmra.mxu1 %vm4499_vm3, %v3429_v54  ;;  %v309_v28 = vsel %vm304_vm4, %v293_v26, %v295_v22  ;;  %v1970_v26 = vld.sshfl [vmem:[#allocation1 + $0x20] sm:$0xff pattern:$0x75316420] }
  0xae   : > { %v339_v33 = vsel %vm3517_vm6, %v310_v27, 0.0  ;;  %v340_v36 = vsel %vm3523_vm7, %v309_v28, 0.0  ;;  %v1684_v27 = vld.sshfl [vmem:[#allocation1 + $0x38] sm:$0xff pattern:$0x75316420]  ;;  %v4536_v28 = vmov 0  ;;  %1990 = vrot.lane.b32.xlu0 %v1970_v26, %s3323_s4 }
  0xaf   : > { %3043 = vmatmul.msk.f32.vlgmr.msrb.gmra.mxu2 %vm4499_vm3, %v3429_v54  ;;  %3046 = vmatmul.msk.f32.vlgmr.msrb.gmra.mxu3 %vm4499_vm3, %v3429_v54  ;;  %1965 = vst [vmem:[#allocation1 + $0x30] ss:$2 sm:$0xff] %v3375_v2  ;;  %v4537_v28 = vsel %vm3655_vm15, 4294967295, %v4536_v28  ;;  %v3072_v26 = vld [vmem:[%s4495_s1 + $0x20] sm:$0xff] }
  0xb0   : > { %3037 = vmatmul.msk.f32.vlgmr.msrb.gmra.mxu0 %vm4499_vm3, %v3429_v54  ;;  %3054 = vmatpush.msk.msra.mxu2 %vm4498_vm1, %v339_v33  ;;  %v3663_v33 = vld [vmem:[%s4495_s1 + $0x8] sm:$0xff] }
  0xb1   : > { %3057 = vmatpush.msk.msra.mxu3 %vm4498_vm1, %v340_v36  ;;  %v4538_v36 = vmov 0  ;;  %1707 = vrot.lane.b32.xlu2 %v1684_v27, %s3322_s24 }
  0xb2   : > { %v299_v43 = vpop.permute.xlu1 %298  ;;  %v4539_v36 = vsel %vm3665_vm0, 4294967295, %v4538_v36 }
  0xb3   : > { %v306_v49 = vsel %vm304_vm4, %v299_v43, %v301_v29 }
  0xb4   : > { %v303_v52 = vpop.permute.xlu0 %302  ;;  %v343_v53 = vsel %vm3554_vm8, %v306_v49, 0.0 }
  0xb5   : > { %v312_v54 = vsel %vm304_vm4, %v303_v52, %v3457_v63  ;;  %3041 = vmatmul.msk.f32.gmra.mxu1 %vm4499_vm3, %v3465_v7  ;;  %v305_v56 = vsel %vm304_vm4, %v301_v29, %v303_v52  ;;  %3066 = vmatpush.msk.msrb.mxu2 %vm4498_vm1, %v343_v53  ;;  %v258_v63 = vand.u32 31, %v3569_v48  ;;  %v1966_v29 = vld.sshfl [vmem:[#allocation1] sm:$0xff pattern:$0x75316420] }
  0xb6   : > { %v321_v58 = vsel %vm313_vm2, %v312_v54, 0.0  ;;  %v344_v59 = vsel %vm3561_vm9, %v305_v56, 0.0  ;;  %1982 = vrot.lane.b32.xlu1 %v1966_v29, %s3323_s4  ;;  %v1973_v54 = vld.sshfl [vmem:[#allocation1 + $0x38] sm:$0xff pattern:$0x75316420] }
  0xb7   : > { %v337_v60 = vsel %vm3573_vm10, %v321_v58, 0.0  ;;  %3044 = vmatmul.msk.f32.gmra.mxu2 %vm4499_vm3, %v3465_v7  ;;  %3047 = vmatmul.msk.f32.gmra.mxu3 %vm4499_vm3, %v3465_v7  ;;  %vm3620_vm13 = vcmp.ge.s32.totalorder %v258_v63, 1  ;;  %v4542_v58 = vmov 0 }
  0xb8   : > { %3038 = vmatmul.msk.f32.gmra.mxu0 %vm4499_vm3, %v3465_v7  ;;  %3069 = vmatpush.msk.msrb.mxu3 %vm4498_vm1, %v344_v59  ;;  %v4530_v7 = vmov 0 }
  0xb9   : > { %3048 = vmatpush.msk.msra.mxu0 %vm4498_vm1, %v337_v60  ;;  %v4531_v7 = vsel %vm3614_vm12, 4294967295, %v4530_v7  ;;  %1996 = vrot.lane.b32.xlu0 %v1973_v54, %s3323_s4  ;;  %v1972_v60 = vld.sshfl [vmem:[#allocation1 + $0x30] sm:$0xff pattern:$0x75316420] }
  0xba   : > { %v862_v9 = vpop.permute.xlu1 %861  ;;  %2270 = vst [vmem:[#allocation1 + $0x30] ss:$2 sm:$0xff] %v3375_v2 }
  0xbb   : > { %v881_v14 = vsel %vm875_vm11, %v862_v9, %v864_v57 }
  0xbc   : > { %v297_v15 = vpop.permute.xlu0 %296  ;;  %v902_v21 = vsel %vm3626_vm14, %v881_v14, 0.0 }
  0xbd   : > { %v308_v16 = vsel %vm304_vm4, %v295_v22, %v297_v15  ;;  %3052 = vmatmul.msk.f32.vlgmr.msra.gmra.mxu1 %vm4499_vm3, %v3609_v6  ;;  %v307_v17 = vsel %vm304_vm4, %v297_v15, %v299_v43  ;;  %v874_v22 = vpop.permute.xlu2 %873  ;;  %vm3673_vm4 = vcmp.le.s32.totalorder %v256_v19, 30 }
  0xbe   : > { %v341_v12 = vsel %vm3614_vm12, %v308_v16, 0.0  ;;  %v342_v18 = vsel %vm3620_vm13, %v307_v17, 0.0  ;;  %v4541_v55 = vsel %vm3673_vm4, 4294967295, %v4540_v55  ;;  %1994 = vrot.lane.b32.xlu1 %v1972_v60, %s3323_s4  ;;  %v1967_v16 = vld.sshfl [vmem:[#allocation1 + $0x8] sm:$0xff pattern:$0x75316420] }
  0xbf   : > { %3055 = vmatmul.msk.f32.vlgmr.msra.gmra.mxu2 %vm4499_vm3, %v3609_v6  ;;  %3058 = vmatmul.msk.f32.vlgmr.msra.gmra.mxu3 %vm4499_vm3, %v3609_v6  ;;  %2264 = vst [vmem:[#allocation1] ss:$2 sm:$0xff] %v3373_v1 }
  0xc0   : > { %3060 = vmatpush.msk.msrb.mxu0 %vm4498_vm1, %v341_v12  ;;  %3063 = vmatpush.msk.msrb.mxu1 %vm4498_vm1, %v342_v18 }
  0xc1   : > { %3049 = vmatmul.msk.f32.vlgmr.msra.gmra.mxu0 %vm4499_vm3, %v3609_v6  ;;  %3080 = vmatpush.msk.msra.mxu2 %vm4498_vm1, %v902_v21 }
  0xc2   : > { %v860_v42 = vpop.permute.xlu1 %859 }
  0xc3   : > { %v882_v62 = vsel %vm875_vm11, %v860_v42, %v862_v9  ;;  %v883_v38 = vsel %vm875_vm11, %v874_v22, %v860_v42 }
  0xc4   : > { %v866_v43 = vpop.permute.xlu0 %865  ;;  %v884_v49 = vsel %vm313_vm2, %v883_v38, 0.0  ;;  %v901_v52 = vsel %vm3655_vm15, %v882_v62, 0.0  ;;  %vm3705_vm2 = vcmp.le.s32.totalorder %v260_v37, 30  ;;  %v4546_v37 = vmov 0 }
  0xc5   : > { %3053 = vmatmul.msk.f32.gmra.mxu1 %vm4499_vm3, %v3663_v33  ;;  %v880_v13 = vsel %vm875_vm11, %v864_v57, %v866_v43  ;;  %v900_v19 = vsel %vm3665_vm0, %v884_v49, 0.0  ;;  %v868_v56 = vpop.permute.xlu2 %867  ;;  %v1969_v57 = vld.sshfl [vmem:[#allocation1 + $0x18] sm:$0xff pattern:$0x75316420]  ;;  %v4543_v58 = vsel %vm3705_vm2, 4294967295, %v4542_v58  ;;  %vm3730_vm0 = vcmp.le.s32.totalorder %v257_v61, 30 }
  0xc6   : > { %v903_v53 = vsel %vm3673_vm4, %v880_v13, 0.0  ;;  %3077 = vmatpush.msk.msra.mxu1 %vm4498_vm1, %v901_v52  ;;  %3074 = vmatpush.msk.msra.mxu0 %vm4498_vm1, %v900_v19  ;;  %2266 = vst [vmem:[#allocation1 + $0x10] ss:$2 sm:$0xff] %v3371_v0  ;;  %v879_v48 = vsel %vm875_vm11, %v866_v43, %v868_v56  ;;  %vm4550_vm4 = vcmask 31744  }
  0xc7   : > { %3056 = vmatmul.msk.f32.gmra.mxu2 %vm4499_vm3, %v3663_v33  ;;  %3059 = vmatmul.msk.f32.gmra.mxu3 %vm4499_vm3, %v3663_v33  ;;  %vm4551_vm14 = vmmov %vm4550_vm4  ;;  %v904_v15 = vsel %vm3730_vm0, %v879_v48, 0.0  ;;  %v2272_v29 = vld.sshfl [vmem:[#allocation1 + $0x8] sm:$0xff pattern:$0x75316420] }
  0xc8   : > { %3083 = vmatpush.msk.msra.mxu3 %vm4498_vm1, %v903_v53  ;;  %1988 = vrot.lane.b32.xlu2 %v1969_v57, %s3323_s4  ;;  %vm3716_vm1 = vcmp.le.s32.totalorder %v258_v63, 30  ;;  %v2271_v19 = vld.sshfl [vmem:[#allocation1] sm:$0xff pattern:$0x75316420]  ;;  %v3073_v53 = vld [vmem:[%s4495_s1 + $0x28] sm:$0xff] }
  0xc9   : > { %3050 = vmatmul.msk.f32.gmra.mxu0 %vm4499_vm3, %v3663_v33  ;;  %v4545_v5 = vsel %vm3716_vm1, 4294967295, %v4544_v5  ;;  %vm3722_vm3 = vcmp.le.s32.totalorder %v259_v30, 30  ;;  %2553 = vst [vmem:[#allocation1] ss:$2 sm:$0xff] %v3373_v1 }
  0xca   : > { %v872_v59 = vpop.permute.xlu1 %871  ;;  %v4547_v37 = vsel %vm3722_vm3, 4294967295, %v4546_v37 }
  0xcb   : > { %v876_v4 = vsel %vm875_vm11, %v872_v59, %v874_v22  ;;  %v1971_v22 = vld.sshfl [vmem:[#allocation1 + $0x28] sm:$0xff pattern:$0x75316420] }
  0xcc   : > { %v870_v63 = vpop.permute.xlu0 %869  ;;  %v907_v20 = vsel %vm3705_vm2, %v876_v4, 0.0  ;;  %vm4552_vm2 = vcmask 1043456   ;;  %2268 = vst [vmem:[#allocation1 + $0x20] ss:$2 sm:$0xff] %v3378_v3 }
  0xcd   : > { %3064 = vmatmul.msk.f32.vlgmr.msrb.gmra.mxu1 %vm4550_vm4, %v3609_v6  ;;  %v877_v30 = vsel %vm875_vm11, %v870_v63, %v872_v59  ;;  %v878_v47 = vsel %vm875_vm11, %v868_v56, %v870_v63  ;;  %vm4553_vm15 = vmmov %vm4552_vm2  ;;  %v2274_v17 = vld.sshfl [vmem:[#allocation1 + $0x18] sm:$0xff pattern:$0x75316420]  ;;  %v2273_v21 = vld.sshfl [vmem:[#allocation1 + $0x10] sm:$0xff pattern:$0x75316420] }
  0xce   : > { %v905_v61 = vsel %vm3716_vm1, %v878_v47, 0.0  ;;  %v906_v14 = vsel %vm3722_vm3, %v877_v30, 0.0  ;;  %vm4554_vm11 = vmmov %vm4550_vm4  ;;  %2293 = vrot.lane.b32.xlu1 %v2274_v17, %s3324_s7  ;;  %2291 = vrot.lane.b32.xlu0 %v2273_v21, %s3324_s7  ;;  %2555 = vst [vmem:[#allocation1 + $0x10] ss:$2 sm:$0xff] %v3371_v0  ;;  %v3098_v17 = vld [vmem:[%s4495_s1 + $0x30] sm:$0xff] }
  0xcf   : > { %3067 = vmatmul.msk.f32.vlgmr.msrb.gmra.mxu2 %vm4551_vm14, %v3609_v6  ;;  %3070 = vmatmul.msk.f32.vlgmr.msrb.gmra.mxu3 %vm4550_vm4, %v3609_v6  ;;  %vm4555_vm1 = vmmov %vm4552_vm2  ;;  %v2277_v4 = vld.sshfl [vmem:[#allocation1 + $0x30] sm:$0xff pattern:$0x75316420] }
  0xd0   : > { %3095 = vmatpush.msk.msrb.mxu3 %vm4552_vm2, %v907_v20  ;;  %3089 = vmatpush.msk.msrb.mxu1 %vm4553_vm15, %v905_v61  ;;  %vm4556_vm3 = vmmov %vm4555_vm1 }
  0xd1   : > { %3061 = vmatmul.msk.f32.vlgmr.msrb.gmra.mxu0 %vm4554_vm11, %v3609_v6  ;;  %3092 = vmatpush.msk.msrb.mxu2 %vm4555_vm1, %v906_v14  ;;  %vm4557_vm14 = vmmov %vm4550_vm4  ;;  %v1171_v6 = vpop.permute.xlu2 %1170 }
  0xd2   : > { %3086 = vmatpush.msk.msrb.mxu0 %vm4556_vm3, %v904_v15  ;;  %v1169_v12 = vpop.permute.xlu1 %1168  ;;  %1984 = vrot.lane.b32.xlu2 %v1967_v16, %s3323_s4  ;;  %vm4558_vm15 = vmmov %vm4550_vm4  ;;  %vm4514_vm3 = vcmp.lt.s32.totalorder %v3420_v50, 1  ;;  %v2561_v16 = vld.sshfl [vmem:[#allocation1 + $0x8] sm:$0xff pattern:$0x75316420] }
  0xd3   : > { %vm4559_vm1 = vmmov %vm4550_vm4  ;;  %v1185_v42 = vsel %vm4514_vm3, %v1169_v12, %v1171_v6  ;;  %v2276_v54 = vld.sshfl [vmem:[#allocation1 + $0x28] sm:$0xff pattern:$0x75316420]  ;;  %v2275_v15 = vld.sshfl [vmem:[#allocation1 + $0x20] sm:$0xff pattern:$0x75316420] }
  0xd4   : > { %v1167_v18 = vpop.permute.xlu0 %1166  ;;  %vm4560_vm2 = vmmov %vm4559_vm1  ;;  %v1192_v49 = vsel %vm3523_vm7, %v1185_v42, 0.0  ;;  %2557 = vst [vmem:[#allocation1 + $0x20] ss:$2 sm:$0xff] %v3378_v3 }
  0xd5   : > { %3065 = vmatmul.msk.f32.gmra.mxu1 %vm4557_vm14, %v3663_v33  ;;  %v1186_v27 = vsel %vm4514_vm3, %v1167_v18, %v1169_v12  ;;  %vm4561_vm4 = vmmov %vm4559_vm1  ;;  %v2563_v14 = vld.sshfl [vmem:[#allocation1 + $0x18] sm:$0xff pattern:$0x75316420] }
  0xd6   : > { %2289 = vrot.lane.b32.xlu1 %v2272_v29, %s3324_s7  ;;  %v1191_v38 = vsel %vm3517_vm6, %v1186_v27, 0.0  ;;  %vm4562_vm11 = vmmov %vm4559_vm1  ;;  %2287 = vrot.lane.b32.xlu0 %v2271_v19, %s3324_s7  ;;  %v2278_v12 = vld.sshfl [vmem:[#allocation1 + $0x38] sm:$0xff pattern:$0x75316420] }
  0xd7   : > { %3068 = vmatmul.msk.f32.gmra.mxu2 %vm4558_vm15, %v3663_v33  ;;  %3071 = vmatmul.msk.f32.gmra.mxu3 %vm4559_vm1, %v3663_v33  ;;  %vm4563_vm14 = vmmov %vm4559_vm1  ;;  %vm4564_vm15 = vcmask 1043456   ;;  %2559 = vst [vmem:[#allocation1 + $0x30] ss:$2 sm:$0xff] %v3375_v2 }
  0xd8   : > { %vm4565_vm1 = vmmov %vm4564_vm15 }
  0xd9   : > { %3062 = vmatmul.msk.f32.gmra.mxu0 %vm4560_vm2, %v3663_v33  ;;  %v1175_v56 = vpop.permute.xlu2 %1174 }
  0xda   : > { %1992 = vrot.lane.b32.xlu2 %v1971_v22, %s3323_s4  ;;  %v1179_v33 = vpop.permute.xlu1 %1178  ;;  %v3124_v22 = vld [vmem:[%s4495_s1 + $0x40] sm:$0xff] }
  0xdb   : > { %v2564_v3 = vld.sshfl [vmem:[#allocation1 + $0x20] sm:$0xff pattern:$0x75316420] }
  0xdc   : > { %v1165_v62 = vpop.permute.xlu0 %1164 }
  0xdd   : > { %3078 = vmatmul.msk.f32.vlgmr.msra.gmra.mxu1 %vm4561_vm4, %v3072_v26  ;;  %v1187_v0 = vsel %vm4514_vm3, %v1165_v62, %v1167_v18  ;;  %v1188_v43 = vsel %vm4514_vm3, %v1179_v33, %v1165_v62  ;;  %vm4566_vm4 = vmmov %vm4565_vm1  ;;  %v2565_v18 = vld.sshfl [vmem:[#allocation1 + $0x28] sm:$0xff pattern:$0x75316420] }
  0xde   : > { %v1190_v52 = vsel %vm3469_vm5, %v1187_v0, 0.0  ;;  %v1189_v13 = vsel %vm3573_vm10, %v1188_v43, 0.0  ;;  %vm4567_vm3 = vmmov %vm4565_vm1  ;;  %2297 = vrot.lane.b32.xlu1 %v2276_v54, %s3324_s7  ;;  %2299 = vrot.lane.b32.xlu0 %v2277_v4, %s3324_s7  ;;  %v2567_v2 = vld.sshfl [vmem:[#allocation1 + $0x38] sm:$0xff pattern:$0x75316420] }
  0xdf   : > { %3081 = vmatmul.msk.f32.vlgmr.msra.gmra.mxu2 %vm4562_vm11, %v3072_v26  ;;  %3084 = vmatmul.msk.f32.vlgmr.msra.gmra.mxu3 %vm4563_vm14, %v3072_v26  ;;  %vm4568_vm11 = vmmov %vm4560_vm2 }
  0xe0   : > { %3103 = vmatpush.msk.msra.mxu1 %vm4564_vm15, %v1190_v52  ;;  %3106 = vmatpush.msk.msra.mxu2 %vm4565_vm1, %v1191_v38  ;;  %vm4569_vm14 = vmmov %vm4560_vm2  ;;  %vm4571_vm1 = vcmp.lt.s32.totalorder %v3420_v50, 1  ;;  %v3125_v52 = vld [vmem:[%s4495_s1 + $0x48] sm:$0xff] }
  0xe1   : > { %3075 = vmatmul.msk.f32.vlgmr.msra.gmra.mxu0 %vm4560_vm2, %v3072_v26  ;;  %3109 = vmatpush.msk.msra.mxu3 %vm4566_vm4, %v1192_v49  ;;  %vm4570_vm15 = vmmov %vm4560_vm2 }
  0xe2   : > { %3100 = vmatpush.msk.msra.mxu0 %vm4567_vm3, %v1189_v13  ;;  %v1173_v57 = vpop.permute.xlu1 %1172  ;;  %vm4572_vm3 = vmmov %vm4560_vm2  ;;  %2295 = vrot.lane.b32.xlu2 %v2275_v15, %s3324_s7 }
  0xe3   : > { %v1183_v60 = vsel %vm4571_vm1, %v1173_v57, %v1175_v56  ;;  %vm4573_vm2 = vmmov %vm4571_vm1 }
  0xe4   : > { %v1177_v59 = vpop.permute.xlu0 %1176  ;;  %vm4574_vm4 = vmmov %vm4571_vm1  ;;  %v1194_v63 = vsel %vm3620_vm13, %v1183_v60, 0.0 }
  0xe5   : > { %3079 = vmatmul.msk.f32.gmra.mxu1 %vm4568_vm11, %v3073_v53  ;;  %v1181_v1 = vsel %vm4573_vm2, %v1177_v59, %v1179_v33  ;;  %v1182_v48 = vsel %vm4574_vm4, %v1175_v56, %v1177_v59  ;;  %vm4575_vm11 = vmmov %vm4571_vm1 }
  0xe6   : > { %v1184_v20 = vsel %vm4575_vm11, %v1171_v6, %v1173_v57  ;;  %v1196_v30 = vsel %vm3561_vm9, %v1181_v1, 0.0  ;;  %v1195_v47 = vsel %vm3554_vm8, %v1182_v48, 0.0  ;;  %vm4578_vm1 = vmmov %vm4572_vm3  ;;  %2582 = vrot.lane.b32.xlu0 %v2563_v14, %s3325_s16  ;;  %2584 = vrot.lane.b32.xlu1 %v2564_v3, %s3325_s16  ;;  %v2560_v6 = vld.sshfl [vmem:[#allocation1] sm:$0xff pattern:$0x75316420] }
  0xe7   : > { %3082 = vmatmul.msk.f32.gmra.mxu2 %vm4569_vm14, %v3073_v53  ;;  %3085 = vmatmul.msk.f32.gmra.mxu3 %vm4570_vm15, %v3073_v53  ;;  %vm4576_vm14 = vmmov %vm4572_vm3  ;;  %vm4577_vm15 = vcmask 1043456   ;;  %v1193_v61 = vsel %vm3614_vm12, %v1184_v20, 0.0  ;;  %v2566_v57 = vld.sshfl [vmem:[#allocation1 + $0x30] sm:$0xff pattern:$0x75316420] }
  0xe8   : > { %vm4580_vm2 = vmmov %vm4577_vm15 }
  0xe9   : > { %3076 = vmatmul.msk.f32.gmra.mxu0 %vm4572_vm3, %v3073_v53  ;;  %vm4579_vm3 = vmmov %vm4578_vm1 }
  0xea   : > { %vm4581_vm4 = vmmov %vm4580_vm2  ;;  %2301 = vrot.lane.b32.xlu2 %v2278_v12, %s3324_s7 }
  0xeb   : > { %vm4582_vm11 = vmmov %vm4578_vm1 }
  0xec   : > { %vm4586_vm8 = vmmov %vm4578_vm1 }
  0xed   : > { %3090 = vmatmul.msk.f32.vlgmr.msrb.gmra.mxu1 %vm4576_vm14, %v3072_v26  ;;  %vm4583_vm14 = vmmov %vm4580_vm2 }
  0xee   : > { %3115 = vmatpush.msk.msrb.mxu1 %vm4577_vm15, %v1194_v63  ;;  %vm4584_vm15 = vmmov %vm4578_vm1  ;;  %2578 = vrot.lane.b32.xlu0 %v2561_v16, %s3325_s16 }
  0xef   : > { %3093 = vmatmul.msk.f32.vlgmr.msrb.gmra.mxu2 %vm4578_vm1, %v3072_v26  ;;  %3096 = vmatmul.msk.f32.vlgmr.msrb.gmra.mxu3 %vm4579_vm3, %v3072_v26  ;;  %vm4585_vm3 = vmmov %vm4578_vm1 }
  0xf0   : > { %3121 = vmatpush.msk.msrb.mxu3 %vm4580_vm2, %v1196_v30  ;;  %3118 = vmatpush.msk.msrb.mxu2 %vm4581_vm4, %v1195_v47  ;;  %vm4587_vm2 = vmmov %vm4578_vm1 }
  0xf1   : > { %3087 = vmatmul.msk.f32.vlgmr.msrb.gmra.mxu0 %vm4582_vm11, %v3072_v26  ;;  %vm4588_vm11 = vmmov %vm4578_vm1  ;;  %2590 = vrot.lane.b32.xlu1 %v2567_v2, %s3325_s16 }
  0xf2   : > { %3112 = vmatpush.msk.msrb.mxu0 %vm4583_vm14, %v1193_v61  ;;  %vm4590_vm14 = vmmov %vm4581_vm4 }
  0xf5   : > { %3091 = vmatmul.msk.f32.gmra.mxu1 %vm4584_vm15, %v3073_v53  ;;  %vm4591_vm15 = vmmov %vm4581_vm4 }
  0xf6   : > { %2586 = vrot.lane.b32.xlu0 %v2565_v18, %s3325_s16 }
  0xf7   : > { %3094 = vmatmul.msk.f32.gmra.mxu2 %vm4578_vm1, %v3073_v53  ;;  %3097 = vmatmul.msk.f32.gmra.mxu3 %vm4585_vm3, %v3073_v53  ;;  %vm4592_vm3 = vmmov %vm4581_vm4 }
  0xf9   : > { %3088 = vmatmul.msk.f32.gmra.mxu0 %vm4586_vm8, %v3073_v53  ;;  %vm4589_vm8 = vmmov %vm4578_vm1 }
  0xfd   : > { %3104 = vmatmul.msk.f32.vlgmr.msra.gmra.mxu1 %vm4587_vm2, %v3098_v17  ;;  %vm4593_vm2 = vmmov %vm4578_vm1 }
  0xfe   : > { %3129 = vmatpush.msk.msra.mxu1 %vm4581_vm4, %v3398_v32  ;;  %v3099_v32 = vld [vmem:[%s4495_s1 + $0x38] sm:$0xff]  ;;  %vm4594_vm4 = vmmov %vm4578_vm1 }
  0xff   : > { %3107 = vmatmul.msk.f32.vlgmr.msra.gmra.mxu2 %vm4588_vm11, %v3098_v17  ;;  %3110 = vmatmul.msk.f32.vlgmr.msra.gmra.mxu3 %vm4589_vm8, %v3098_v17  ;;  %vm4595_vm11 = vmmov %vm4578_vm1 }
 0x100   : > { %3132 = vmatpush.msk.msra.mxu2 %vm4590_vm14, %v3408_v39  ;;  %3135 = vmatpush.msk.msra.mxu3 %vm4591_vm15, %v3410_v40  ;;  %vm4596_vm8 = vmmov %vm4578_vm1  ;;  %v1698_v39 = vpop.permute.xlu2 %1697  ;;  %v2562_v40 = vld.sshfl [vmem:[#allocation1 + $0x10] sm:$0xff pattern:$0x75316420] }
 0x101   : > { %3101 = vmatmul.msk.f32.vlgmr.msra.gmra.mxu0 %vm4578_vm1, %v3098_v17  ;;  %vm4597_vm14 = vmmov %vm4578_vm1  ;;  %2580 = vrot.lane.b32.xlu2 %v2562_v40, %s3325_s16 }
 0x102   : > { %3126 = vmatpush.msk.msra.mxu0 %vm4592_vm3, %v3396_v31  ;;  %v1700_v31 = vpop.permute.xlu0 %1699  ;;  %vm4598_vm15 = vmmov %vm4592_vm3 }
 0x103   : > { %vm4599_vm3 = vmmov %vm4578_vm1 }
 0x105   : > { %3105 = vmatmul.msk.f32.gmra.mxu1 %vm4593_vm2, %v3099_v32  ;;  %vm4600_vm2 = vmmov %vm4598_vm15 }
 0x107   : > { %3108 = vmatmul.msk.f32.gmra.mxu2 %vm4594_vm4, %v3099_v32  ;;  %3111 = vmatmul.msk.f32.gmra.mxu3 %vm4595_vm11, %v3099_v32  ;;  %vm4601_vm4 = vmmov %vm4600_vm2 }
 0x108   : > { %vm4602_vm11 = vmmov %vm4578_vm1  ;;  %v1694_v21 = vpop.permute.xlu2 %1693 }
 0x109   : > { %3102 = vmatmul.msk.f32.gmra.mxu0 %vm4596_vm8, %v3099_v32  ;;  %vm4603_vm8 = vmmov %vm4600_vm2  ;;  %2576 = vrot.lane.b32.xlu2 %v2560_v6, %s3325_s16  ;;  %v3150_v6 = vld [vmem:[%s4495_s1 + $0x50] sm:$0xff] }
 0x10d   : > { %3116 = vmatmul.msk.f32.vlgmr.msrb.gmra.mxu1 %vm4597_vm14, %v3098_v17  ;;  %vm4604_vm14 = vmmov %vm4578_vm1 }
 0x10e   : > { %3141 = vmatpush.msk.msrb.mxu1 %vm4598_vm15, %v3416_v46  ;;  %vm4516_vm15 = vcmp.lt.s32.totalorder %v3420_v50, 127  ;;  %v1696_v46 = vpop.permute.xlu0 %1695 }
 0x10f   : > { %3119 = vmatmul.msk.f32.vlgmr.msrb.gmra.mxu2 %vm4578_vm1, %v3098_v17  ;;  %3122 = vmatmul.msk.f32.vlgmr.msrb.gmra.mxu3 %vm4599_vm3, %v3098_v17  ;;  %vm4605_vm3 = vmmov %vm4578_vm1  ;;  %v1714_v26 = vsel %vm4516_vm15, %v1698_v39, %v1700_v31  ;;  %v1716_v42 = vsel %vm4516_vm15, %v1694_v21, %v1696_v46 }
 0x110   : > { %3144 = vmatpush.msk.msrb.mxu2 %vm4600_vm2, %v3402_v34  ;;  %3147 = vmatpush.msk.msrb.mxu3 %vm4601_vm4, %v3404_v35  ;;  %v1702_v34 = vpop.permute.xlu1 %1701  ;;  %v1715_v35 = vsel %vm4516_vm15, %v1696_v46, %v1698_v39  ;;  %vm4606_vm2 = vmmov %vm4578_vm1  ;;  %vm4607_vm4 = vnez %v4537_v28  ;;  %v1708_v19 = vpop.permute.xlu2 %1707 }
 0x111   : > { %3113 = vmatmul.msk.f32.vlgmr.msrb.gmra.mxu0 %vm4602_vm11, %v3098_v17  ;;  %v1713_v27 = vsel %vm4516_vm15, %v1700_v31, %v1702_v34  ;;  %v1719_v29 = vsel %vm4607_vm4, %v1715_v35, 0.0  ;;  %vm4608_vm11 = vmmov %vm4578_vm1  ;;  %vm4613_vm4 = vnez %v4539_v36  ;;  %2588 = vrot.lane.b32.xlu2 %v2566_v57, %s3325_s16 }
 0x112   : > { %3138 = vmatpush.msk.msrb.mxu0 %vm4603_vm8, %v3414_v45  ;;  %vm4609_vm8 = vnez %v4535_v11  ;;  %v1718_v0 = vsel %vm4613_vm4, %v1716_v42, 0.0 }
 0x113   : > { %v1720_v62 = vsel %vm4609_vm8, %v1714_v26, 0.0 }
 0x115   : > { %3117 = vmatmul.msk.f32.gmra.mxu1 %vm4604_vm14, %v3099_v32  ;;  %vm4610_vm14 = vnez %v4541_v55 }
 0x116   : > { %v1721_v38 = vsel %vm4610_vm14, %v1713_v27, 0.0  ;;  %v1704_v56 = vpop.permute.xlu0 %1703 }
 0x117   : > { %3120 = vmatmul.msk.f32.gmra.mxu2 %vm4578_vm1, %v3099_v32  ;;  %3123 = vmatmul.msk.f32.gmra.mxu3 %vm4605_vm3, %v3099_v32  ;;  %vm4611_vm1 = vcmask 1043456   ;;  %vm4612_vm3 = vmmov %vm4606_vm2 }
 0x118   : > { %vm4614_vm15 = vmmov %vm4611_vm1  ;;  %v1706_v54 = vpop.permute.xlu1 %1705 }
 0x119   : > { %3114 = vmatmul.msk.f32.gmra.mxu0 %vm4606_vm2, %v3099_v32  ;;  %vm4615_vm12 = vmmov %vm4611_vm1 }
 0x11a   : > { %v3895_v45 = vpop.f32.mrf.mxu1 }
 0x11d   : > { %v3908_v33 = vpop.f32.mrf.mxu0  ;;  %3130 = vmatmul.msk.f32.vlgmr.msra.gmra.mxu1 %vm4608_vm11, %v3124_v22  ;;  %vm4616_vm11 = vmmov %vm4606_vm2 }
 0x11e   : > { %3155 = vmatpush.msk.msra.mxu1 %vm4611_vm1, %v1719_v29 }
 0x11f   : > { %3133 = vmatmul.msk.f32.vlgmr.msra.gmra.mxu2 %vm4612_vm3, %v3124_v22  ;;  %3136 = vmatmul.msk.f32.vlgmr.msra.gmra.mxu3 %vm4606_vm2, %v3124_v22  ;;  %vm4619_vm3 = vmmov %vm4606_vm2 }
 0x120   : > { %3158 = vmatpush.msk.msra.mxu2 %vm4614_vm15, %v1720_v62  ;;  %3161 = vmatpush.msk.msra.mxu3 %vm4615_vm12, %v1721_v38  ;;  %vm4617_vm15 = vmmov %vm4606_vm2  ;;  %v1987_v17 = vpop.permute.xlu1 %1986  ;;  %v1991_v31 = vpop.permute.xlu0 %1990  ;;  %v3151_v38 = vld [vmem:[%s4495_s1 + $0x58] sm:$0xff] }
 0x121   : > { %3127 = vmatmul.msk.f32.vlgmr.msra.gmra.mxu0 %vm4616_vm11, %v3124_v22  ;;  %vm4618_vm12 = vmmov %vm4606_vm2  ;;  %vm4620_vm2 = vcmp.lt.s32.totalorder %v3420_v50, 127 }
 0x122   : > { %v3923_v43 = vpop.f32.mrf.mxu2  ;;  %v3925_v49 = vpop.f32.mrf.mxu3  ;;  %3152 = vmatpush.msk.msra.mxu0 %vm4611_vm1, %v1718_v0  ;;  %v1711_v59 = vsel %vm4620_vm2, %v1704_v56, %v1706_v54  ;;  %vm4621_vm11 = vmmov %vm4619_vm3 }
 0x123   : > { %v3931_v13 = vpop.f32.mrf.mxu1  ;;  %vm4622_vm1 = vmmov %vm4620_vm2  ;;  %v1989_v15 = vpop.permute.xlu2 %1988 }
 0x124   : > { %v1717_v1 = vsel %vm4622_vm1, %v1708_v19, %v1694_v21  ;;  %vm4626_vm2 = vmmov %vm4621_vm11 }
 0x125   : > { %v3933_v53 = vpop.f32.mrf.mxu0  ;;  %3131 = vmatmul.msk.f32.gmra.mxu1 %vm4617_vm15, %v3125_v52  ;;  %vm4623_vm15 = vmmov %vm4622_vm1 }
 0x126   : > { %v1710_v48 = vsel %vm4623_vm15, %v1706_v54, %v1708_v19  ;;  %vm4629_vm15 = vcmask 1043456   ;;  %vm4630_vm4 = vmmov %vm4626_vm2 }
 0x127   : > { %3134 = vmatmul.msk.f32.gmra.mxu2 %vm4618_vm12, %v3125_v52  ;;  %3137 = vmatmul.msk.f32.gmra.mxu3 %vm4619_vm3, %v3125_v52  ;;  %vm4624_vm12 = vnez %v4545_v5  ;;  %vm4625_vm3 = vmmov %vm4622_vm1  ;;  %vm4628_vm1 = vnez %v4547_v37 }
 0x128   : > { %v1723_v20 = vsel %vm4624_vm12, %v1711_v59, 0.0  ;;  %v1712_v30 = vsel %vm4625_vm3, %v1702_v34, %v1704_v56  ;;  %v1724_v14 = vsel %vm4628_vm1, %v1710_v48, 0.0  ;;  %vm4631_vm14 = vmmov %vm4626_vm2  ;;  %v1983_v40 = vpop.permute.xlu1 %1982 }
 0x129   : > { %3128 = vmatmul.msk.f32.gmra.mxu0 %vm4621_vm11, %v3125_v52  ;;  %vm4627_vm11 = vnez %v4543_v58  ;;  %v1722_v16 = vsel %vm3730_vm0, %v1712_v30, 0.0  ;;  %vm4632_vm3 = vmmov %vm4629_vm15 }
 0x12a   : > { %v3942_v60 = vpop.f32.mrf.mxu2  ;;  %v3944_v4 = vpop.f32.mrf.mxu3  ;;  %v1725_v61 = vsel %vm4627_vm11, %v1717_v1, 0.0  ;;  %vm4634_vm12 = vmmov %vm4630_vm4 }
 0x12b   : > { %v3950_v63 = vpop.f32.mrf.mxu1  ;;  %v1997_v19 = vpop.permute.xlu0 %1996 }
 0x12c   : > { %v1985_v2 = vpop.permute.xlu2 %1984 }
 0x12d   : > { %v3956_v47 = vpop.f32.mrf.mxu0  ;;  %3142 = vmatmul.msk.f32.vlgmr.msrb.gmra.mxu1 %vm4626_vm2, %v3124_v22  ;;  %vm4633_vm2 = vmmov %vm4632_vm3 }
 0x12e   : > { %3167 = vmatpush.msk.msrb.mxu1 %vm4629_vm15, %v1723_v20  ;;  %vm4635_vm1 = vmmov %vm4633_vm2 }
 0x12f   : > { %3145 = vmatmul.msk.f32.vlgmr.msrb.gmra.mxu2 %vm4630_vm4, %v3124_v22  ;;  %3148 = vmatmul.msk.f32.vlgmr.msrb.gmra.mxu3 %vm4631_vm14, %v3124_v22  ;;  %vm1998_vm14 = vcmp.lt.s32.totalorder %v3420_v50, 97  ;;  %vm4636_vm15 = vmmov %vm4630_vm4 }
 0x130   : > { %3173 = vmatpush.msk.msrb.mxu3 %vm4632_vm3, %v1725_v61  ;;  %3170 = vmatpush.msk.msrb.mxu2 %vm4633_vm2, %v1724_v14  ;;  %vm4637_vm3 = vmmov %vm4630_vm4  ;;  %v2004_v39 = vsel %vm1998_vm14, %v1985_v2, %v1987_v17  ;;  %v2003_v35 = vsel %vm1998_vm14, %v1987_v17, %v1989_v15  ;;  %v2002_v21 = vsel %vm1998_vm14, %v1989_v15, %v1991_v31  ;;  %v1995_v54 = vpop.permute.xlu1 %1994 }
 0x131   : > { %3139 = vmatmul.msk.f32.vlgmr.msrb.gmra.mxu0 %vm4634_vm12, %v3124_v22  ;;  %vm4638_vm12 = vmmov %vm4637_vm3  ;;  %v2024_v26 = vsel %vm3469_vm5, %v2004_v39, 0.0  ;;  %v2005_v27 = vsel %vm1998_vm14, %v1983_v40, %v1985_v2  ;;  %v2025_v29 = vsel %vm3517_vm6, %v2003_v35, 0.0  ;;  %v2026_v42 = vsel %vm3523_vm7, %v2002_v21, 0.0 }
 0x132   : > { %v3971_v12 = vpop.f32.mrf.mxu2  ;;  %v3973_v3 = vpop.f32.mrf.mxu3  ;;  %3164 = vmatpush.msk.msrb.mxu0 %vm4635_vm1, %v1722_v16  ;;  %vm4639_vm1 = vmmov %vm4637_vm3  ;;  %v2023_v8 = vsel %vm3573_vm10, %v2005_v27, 0.0  ;;  %v1999_v20 = vsel %vm1998_vm14, %v1995_v54, %v1997_v19  ;;  %v3176_v27 = vld [vmem:[%s4495_s1 + $0x60] sm:$0xff] }
 0x133   : > { %v3976_v18 = vpop.f32.mrf.mxu1  ;;  %vm4642_vm5 = vmmov %vm4633_vm2 }
 0x134   : > { %vm4645_vm6 = vmmov %vm4633_vm2  ;;  %v1993_v57 = vpop.permute.xlu2 %1992 }
 0x135   : > { %v3978_v32 = vpop.f32.mrf.mxu0  ;;  %3143 = vmatmul.msk.f32.gmra.mxu1 %vm4630_vm4, %v3125_v52  ;;  %vm4640_vm4 = vmmov %vm4639_vm1  ;;  %v2001_v16 = vsel %vm1998_vm14, %v1991_v31, %v1993_v57 }
 0x136   : > { %vm4646_vm7 = vmmov %vm4639_vm1 }
 0x137   : > { %3146 = vmatmul.msk.f32.gmra.mxu2 %vm4636_vm15, %v3125_v52  ;;  %3149 = vmatmul.msk.f32.gmra.mxu3 %vm4637_vm3, %v3125_v52  ;;  %vm4641_vm15 = vmmov %vm4639_vm1 }
 0x138   : > { %vm4643_vm3 = vmmov %vm4633_vm2 }
 0x139   : > { %3140 = vmatmul.msk.f32.gmra.mxu0 %vm4638_vm12, %v3125_v52  ;;  %vm4644_vm12 = vmmov %vm4639_vm1 }
 0x13a   : > { %v3987_v46 = vpop.f32.mrf.mxu2  ;;  %v3989_v34 = vpop.f32.mrf.mxu3  ;;  %vm4647_vm10 = vmmov %vm4639_vm1 }
 0x13b   : > { %v3998_v22 = vpop.f32.mrf.mxu1 }
 0x13d   : > { %3156 = vmatmul.msk.f32.vlgmr.msra.gmra.mxu1 %vm4639_vm1, %v3150_v6 }
 0x13e   : > { %v4009_v62 = vpop.f32.mrf.mxu0  ;;  %3181 = vmatpush.msk.msra.mxu1 %vm4633_vm2, %v2024_v26  ;;  %vm2014_vm2 = vcmp.lt.s32.totalorder %v3528_v25, 992 }
 0x13f   : > { %3159 = vmatmul.msk.f32.vlgmr.msra.gmra.mxu2 %vm4640_vm4, %v3150_v6  ;;  %3162 = vmatmul.msk.f32.vlgmr.msra.gmra.mxu3 %vm4641_vm15, %v3150_v6  ;;  %vm4648_vm4 = vmmov %vm4639_vm1 }
 0x140   : > { %3184 = vmatpush.msk.msra.mxu2 %vm4642_vm5, %v2025_v29  ;;  %3187 = vmatpush.msk.msra.mxu3 %vm4643_vm3, %v2026_v42  ;;  %vm4649_vm15 = vmmov %vm4639_vm1  ;;  %vm4650_vm5 = vnez %v4525_v41  ;;  %v2292_v31 = vpop.permute.xlu0 %2291 }
 0x141   : > { %3153 = vmatmul.msk.f32.vlgmr.msra.gmra.mxu0 %vm4644_vm12, %v3150_v6  ;;  %vm4651_vm12 = vmmov %vm4639_vm1 }
 0x142   : > { %v715_v23 = vpop.f32.mrf.mxu2  ;;  %v738_v24 = vpop.f32.mrf.mxu3  ;;  %3178 = vmatpush.msk.msra.mxu0 %vm4645_vm6, %v2023_v8  ;;  %vm4652_vm6 = vmmov %vm4639_vm1 }
 0x143   : > { %v4024_v0 = vadd.f32 %v715_v23, %v3923_v43  ;;  %v4027_v51 = vadd.f32 %v738_v24, %v3925_v49  ;;  %v4029_v52 = vpop.f32.mrf.mxu1  ;;  %v2006_v43 = vsel %vm1998_vm14, %v1997_v19, %v1983_v40  ;;  %v2000_v49 = vsel %vm1998_vm14, %v1993_v57, %v1995_v54  ;;  %vm4654_vm14 = vmmov %vm4643_vm3  ;;  %v3177_v57 = vld [vmem:[%s4495_s1 + $0x68] sm:$0xff] }
 0x144   : > { %v2022_v48 = vsel %vm2014_vm2, %v2006_v43, 0.0  ;;  %v2028_v15 = vsel %vm3620_vm13, %v2000_v49, 0.0  ;;  %vm4653_vm13 = vnez %v4531_v7  ;;  %v696_v11 = vadd.f32 %v4029_v52, %v3931_v13 }
 0x145   : > { %3157 = vmatmul.msk.f32.gmra.mxu1 %vm4646_vm7, %v3151_v38  ;;  %v2030_v17 = vsel %vm3561_vm9, %v2022_v48, 0.0  ;;  %v2027_v10 = vsel %vm4653_vm13, %v2001_v16, 0.0  ;;  %vm4655_vm7 = vmmov %vm4643_vm3 }
 0x146   : > { %v4032_v56 = vpop.f32.mrf.mxu0  ;;  %vm4656_vm9 = vmmov %vm4639_vm1 }
 0x147   : > { %3160 = vmatmul.msk.f32.gmra.mxu2 %vm4647_vm10, %v3151_v38  ;;  %3163 = vmatmul.msk.f32.gmra.mxu3 %vm4639_vm1, %v3151_v38  ;;  %vm4657_vm10 = vmmov %vm4643_vm3 }
 0x148   : > { %v2288_v21 = vpop.permute.xlu0 %2287  ;;  %vm4663_vm13 = vmmov %vm4639_vm1 }
 0x149   : > { %3154 = vmatmul.msk.f32.gmra.mxu0 %vm4648_vm4, %v3151_v38  ;;  %vm4658_vm4 = vmmov %vm4639_vm1 }
 0x14a   : > { %v718_v59 = vpop.f32.mrf.mxu2  ;;  %v741_v1 = vpop.f32.mrf.mxu3 }
 0x14b   : > { %v4047_v30 = vadd.f32 %v718_v59, %v3942_v60  ;;  %v4050_v61 = vadd.f32 %v741_v1, %v3944_v4  ;;  %v4052_v14 = vpop.f32.mrf.mxu1  ;;  %v2029_v60 = vsel %vm4650_vm5, %v1999_v20, 0.0  ;;  %v2294_v4 = vpop.permute.xlu1 %2293  ;;  %vm2303_vm5 = vcmp.lt.s32.totalorder %v3420_v50, 96 }
 0x14c   : > { %v2308_v24 = vsel %vm2303_vm5, %v2292_v31, %v2294_v4 }
 0x14d   : > { %3168 = vmatmul.msk.f32.vlgmr.msrb.gmra.mxu1 %vm4649_vm15, %v3150_v6  ;;  %vm4659_vm15 = vmmov %vm4639_vm1 }
 0x14e   : > { %v4063_v2 = vpop.f32.mrf.mxu0  ;;  %3193 = vmatpush.msk.msrb.mxu1 %vm4643_vm3, %v2028_v15  ;;  %vm4660_vm3 = vmmov %vm4639_vm1 }
 0x14f   : > { %3171 = vmatmul.msk.f32.vlgmr.msrb.gmra.mxu2 %vm4651_vm12, %v3150_v6  ;;  %3174 = vmatmul.msk.f32.vlgmr.msrb.gmra.mxu3 %vm4652_vm6, %v3150_v6  ;;  %vm4661_vm12 = vmmov %vm4639_vm1 }
 0x150   : > { %3199 = vmatpush.msk.msrb.mxu3 %vm4654_vm14, %v2030_v17  ;;  %3196 = vmatpush.msk.msrb.mxu2 %vm4655_vm7, %v2029_v60  ;;  %vm4662_vm6 = vmmov %vm4655_vm7  ;;  %v2300_v1 = vpop.permute.xlu0 %2299 }
 0x151   : > { %3165 = vmatmul.msk.f32.vlgmr.msrb.gmra.mxu0 %vm4656_vm9, %v3150_v6  ;;  %vm4664_vm14 = vmmov %vm4639_vm1 }
 0x152   : > { %v807_v41 = vpop.f32.mrf.mxu2  ;;  %v830_v44 = vpop.f32.mrf.mxu3  ;;  %3190 = vmatpush.msk.msrb.mxu0 %vm4657_vm10, %v2027_v10  ;;  %vm4665_vm7 = vmmov %vm4662_vm6 }
 0x153   : > { %v4075_v39 = vadd.f32 %v807_v41, %v3971_v12  ;;  %v4078_v40 = vadd.f32 %v830_v44, %v3973_v3  ;;  %v4080_v35 = vpop.f32.mrf.mxu1  ;;  %v2290_v6 = vpop.permute.xlu1 %2289  ;;  %vm4666_vm9 = vmmov %vm4662_vm6 }
 0x154   : > { %v2296_v12 = vpop.permute.xlu2 %2295  ;;  %v2309_v23 = vsel %vm2303_vm5, %v2290_v6, %v2292_v31  ;;  %vm4667_vm10 = vmmov %vm4639_vm1  ;;  %v788_v58 = vadd.f32 %v4080_v35, %v3976_v18 }
 0x155   : > { %3169 = vmatmul.msk.f32.gmra.mxu1 %vm4639_vm1, %v3151_v38  ;;  %vm4668_vm1 = vmmov %vm4662_vm6 }
 0x156   : > { %v4083_v7 = vpop.f32.mrf.mxu0 }
 0x157   : > { %3172 = vmatmul.msk.f32.gmra.mxu2 %vm4658_vm4, %v3151_v38  ;;  %3175 = vmatmul.msk.f32.gmra.mxu3 %vm4659_vm15, %v3151_v38  ;;  %vm4669_vm4 = vmmov %vm4660_vm3  ;;  %v765_v9 = vadd.f32 %v4083_v7, %v3978_v32 }
 0x158   : > { %vm4670_vm15 = vmmov %vm4660_vm3  ;;  %v2583_v44 = vpop.permute.xlu0 %2582 }
 0x159   : > { %3166 = vmatmul.msk.f32.gmra.mxu0 %vm4660_vm3, %v3151_v38  ;;  %v2307_v38 = vsel %vm2303_vm5, %v2294_v4, %v2296_v12 }
 0x15a   : > { %v810_v26 = vpop.f32.mrf.mxu2  ;;  %v833_v3 = vpop.f32.mrf.mxu3 }
 0x15b   : > { %v4093_v29 = vadd.f32 %v810_v26, %v3987_v46  ;;  %v4096_v42 = vadd.f32 %v833_v3, %v3989_v34  ;;  %v4098_v8 = vpop.f32.mrf.mxu1  ;;  %v2310_v46 = vsel %vm2303_vm5, %v2288_v21, %v2290_v6  ;;  %v2298_v15 = vpop.permute.xlu1 %2297 }
 0x15c   : > { %v2302_v20 = vpop.permute.xlu2 %2301  ;;  %v2305_v10 = vsel %vm2303_vm5, %v2298_v15, %v2300_v1 }
 0x15d   : > { %3182 = vmatmul.msk.f32.vlgmr.msra.gmra.mxu1 %vm4661_vm12, %v3176_v27  ;;  %vm4671_vm12 = vmmov %vm4660_vm3  ;;  %v2304_v41 = vsel %vm2303_vm5, %v2300_v1, %v2302_v20 }
 0x15e   : > { %v4107_v19 = vpop.f32.mrf.mxu0  ;;  %3207 = vmatpush.msk.msra.mxu1 %vm4662_vm6, %v2309_v23  ;;  %vm4672_vm6 = vmmov %vm4660_vm3 }
 0x15f   : > { %3185 = vmatmul.msk.f32.vlgmr.msra.gmra.mxu2 %vm4663_vm13, %v3176_v27  ;;  %3188 = vmatmul.msk.f32.vlgmr.msra.gmra.mxu3 %vm4664_vm14, %v3176_v27  ;;  %vm4673_vm13 = vmmov %vm4668_vm1 }
 0x160   : > { %3210 = vmatpush.msk.msra.mxu2 %vm4665_vm7, %v2308_v24  ;;  %3213 = vmatpush.msk.msra.mxu3 %vm4666_vm9, %v2307_v38  ;;  %vm4674_vm14 = vmmov %vm4660_vm3 }
 0x161   : > { %3179 = vmatmul.msk.f32.vlgmr.msra.gmra.mxu0 %vm4667_vm10, %v3176_v27  ;;  %vm4675_vm7 = vmmov %vm4660_vm3 }
 0x162   : > { %v1004_v34 = vpop.f32.mrf.mxu2  ;;  %v1027_v54 = vpop.f32.mrf.mxu3  ;;  %3204 = vmatpush.msk.msra.mxu0 %vm4668_vm1, %v2310_v46  ;;  %vm4676_vm9 = vmmov %vm4668_vm1 }
 0x163   : > { %v4122_v43 = vadd.f32 %v1004_v34, %v4024_v0  ;;  %v4125_v49 = vadd.f32 %v1027_v54, %v4027_v51  ;;  %v4127_v59 = vpop.f32.mrf.mxu1  ;;  %v2311_v51 = vsel %vm2303_vm5, %v2302_v20, %v2288_v21  ;;  %vm4677_vm10 = vmmov %vm4668_vm1  ;;  %v4177_v38 = vpop.permute.xlu1 %2584  ;;  %v4188_v20 = vld [vmem:[%s4495_s1 + $0x70] sm:$0xff] }
 0x164   : > { %v2319_v31 = vsel %vm2014_vm2, %v2311_v51, 0.0  ;;  %vm4678_vm1 = vmmov %vm4660_vm3 }
 0x165   : > { %3183 = vmatmul.msk.f32.gmra.mxu1 %vm4669_vm4, %v3177_v57  ;;  %vm4679_vm4 = vmmov %vm4676_vm9 }
 0x166   : > { %v4130_v48 = vpop.f32.mrf.mxu0 }
 0x167   : > { %3186 = vmatmul.msk.f32.gmra.mxu2 %vm4670_vm15, %v3177_v57  ;;  %3189 = vmatmul.msk.f32.gmra.mxu3 %vm4660_vm3, %v3177_v57  ;;  %vm2592_vm15 = vcmp.lt.s32.totalorder %v3420_v50, 95  ;;  %vm4681_vm3 = vmmov %vm4678_vm1 }
 0x169   : > { %3180 = vmatmul.msk.f32.gmra.mxu0 %vm4671_vm12, %v3177_v57  ;;  %vm4682_vm12 = vmmov %vm4678_vm1 }
 0x16a   : > { %v1007_v0 = vpop.f32.mrf.mxu2  ;;  %v1030_v16 = vpop.f32.mrf.mxu3 }
 0x16b   : > { %v4138_v17 = vadd.f32 %v1007_v0, %v4047_v30  ;;  %v4141_v60 = vadd.f32 %v1030_v16, %v4050_v61  ;;  %v4143_v4 = vpop.f32.mrf.mxu1  ;;  %v2306_v30 = vsel %vm2303_vm5, %v2296_v12, %v2298_v15  ;;  %v2581_v61 = vpop.permute.xlu2 %2580  ;;  %vm4680_vm5 = vmmov %vm4678_vm1 }
 0x16c   : > { %v2597_v15 = vsel %vm2592_vm15, %v2581_v61, %v2583_v44 }
 0x16d   : > { %3194 = vmatmul.msk.f32.vlgmr.msrb.gmra.mxu1 %vm4672_vm6, %v3176_v27  ;;  %vm4683_vm6 = vmmov %vm4678_vm1 }
 0x16e   : > { %v4152_v6 = vpop.f32.mrf.mxu0  ;;  %3219 = vmatpush.msk.msrb.mxu1 %vm4673_vm13, %v2305_v10  ;;  %vm4684_vm13 = vnez %v4537_v28 }
 0x16f   : > { %3197 = vmatmul.msk.f32.vlgmr.msrb.gmra.mxu2 %vm4674_vm14, %v3176_v27  ;;  %3200 = vmatmul.msk.f32.vlgmr.msrb.gmra.mxu3 %vm4675_vm7, %v3176_v27  ;;  %vm4685_vm14 = vmmov %vm4678_vm1  ;;  %vm4686_vm7 = vnez %v4541_v55  ;;  %v1134_v55 = vadd.f32 %v4127_v59, %v696_v11 }
 0x170   : > { %3225 = vmatpush.msk.msrb.mxu3 %vm4676_vm9, %v2319_v31  ;;  %3222 = vmatpush.msk.msrb.mxu2 %vm4677_vm10, %v2304_v41  ;;  %vm4687_vm9 = vmmov %vm4679_vm4 }
 0x171   : > { %3191 = vmatmul.msk.f32.vlgmr.msrb.gmra.mxu0 %vm4678_vm1, %v3176_v27  ;;  %v2579_v27 = vpop.permute.xlu0 %2578  ;;  %vm4688_vm10 = vmmov %vm4678_vm1 }
 0x172   : > { %v1096_v21 = vpop.f32.mrf.mxu2  ;;  %v1119_v26 = vpop.f32.mrf.mxu3  ;;  %3216 = vmatpush.msk.msrb.mxu0 %vm4679_vm4, %v2306_v30  ;;  %vm4689_vm4 = vnez %v4539_v36  ;;  %v673_v36 = vadd.f32 %v4032_v56, %v3933_v53 }
 0x173   : > { %v4164_v3 = vadd.f32 %v1096_v21, %v4075_v39  ;;  %v4167_v23 = vadd.f32 %v1119_v26, %v4078_v40  ;;  %v4169_v24 = vpop.f32.mrf.mxu1  ;;  %v693_v39 = vadd.f32 %v3998_v22, %v3895_v45  ;;  %v2598_v40 = vsel %vm2592_vm15, %v2579_v27, %v2581_v61  ;;  %v2577_v46 = vpop.permute.xlu2 %2576 }
 0x174   : > { %v2596_v45 = vsel %vm2592_vm15, %v2583_v44, %v4177_v38  ;;  %v670_v22 = vadd.f32 %v4009_v62, %v3908_v33  ;;  %v2610_v16 = vsel %vm4684_vm13, %v2598_v40, 0.0  ;;  %v2599_v10 = vsel %vm2592_vm15, %v2577_v46, %v2579_v27  ;;  %v4235_v44 = vld [vmem:[%s4495_s1 + $0x78] sm:$0xff]  ;;  %v2591_v61 = vpop.permute.xlu1 %2590  ;;  %vm4695_vm13 = vmmov %vm4678_vm1 }
 0x175   : > { %3195 = vmatmul.msk.f32.gmra.mxu1 %vm4680_vm5, %v3177_v57  ;;  %v1126_v34 = vadd.f32 %v4098_v8, %v693_v39  ;;  %v2611_v33 = vsel %vm4609_vm8, %v2597_v15, 0.0  ;;  %v2612_v62 = vsel %vm4686_vm7, %v2596_v45, 0.0  ;;  %vm4690_vm8 = vmmov %vm4687_vm9  ;;  %v1133_v21 = vadd.f32 %v4130_v48, %v673_v36 }
 0x176   : > { %v4173_v12 = vpop.f32.mrf.mxu0  ;;  %v1125_v31 = vadd.f32 %v4107_v19, %v670_v22  ;;  %vm4691_vm5 = vmmov %vm4690_vm8  ;;  %v2600_v56 = vsel %vm2592_vm15, %v2591_v61, %v2577_v46  ;;  %v762_v48 = vadd.f32 %v4063_v2, %v3956_v47 }
 0x177   : > { %3198 = vmatmul.msk.f32.gmra.mxu2 %vm4681_vm3, %v3177_v57  ;;  %3201 = vmatmul.msk.f32.gmra.mxu3 %vm4682_vm12, %v3177_v57  ;;  %vm4692_vm3 = vmmov %vm4678_vm1 }
 0x178   : > { %vm4693_vm12 = vmmov %vm4691_vm5 }
 0x179   : > { %3192 = vmatmul.msk.f32.gmra.mxu0 %vm4683_vm6, %v3177_v57  ;;  %vm4694_vm6 = vmmov %vm4678_vm1  ;;  %v2587_v53 = vpop.permute.xlu0 %2586 }
 0x17a   : > { %v1099_v54 = vpop.f32.mrf.mxu2  ;;  %v1122_v1 = vpop.f32.mrf.mxu3  ;;  %vm4697_vm7 = vmmov %vm4678_vm1  ;;  %v2595_v25 = vsel %vm2592_vm15, %v4177_v38, %v2587_v53 }
 0x17b   : > { %v4198_v57 = vadd.f32 %v1099_v54, %v4093_v29  ;;  %v4201_v8 = vadd.f32 %v1122_v1, %v4096_v42  ;;  %v1270_v0 = vpop.f32.mrf.mxu1  ;;  %v2609_v42 = vsel %vm4689_vm4, %v2599_v10, 0.0  ;;  %v2589_v26 = vpop.permute.xlu2 %2588  ;;  %v2608_v1 = vsel %vm2014_vm2, %v2600_v56, 0.0  ;;  %vm4699_vm2 = vmmov %vm4678_vm1 }
 0x17c   : > { %v4205_v51 = vadd.f32 %v1270_v0, %v1126_v34  ;;  %v2593_v46 = vsel %vm2592_vm15, %v2589_v26, %v2591_v61  ;;  %vm4702_vm4 = vmmov %vm4678_vm1 }
 0x17d   : > { %3208 = vmatmul.msk.f32.vlgmr.msra.gmra.mxu1 %vm4685_vm14, %v4188_v20  ;;  %vm4696_vm14 = vmmov %vm4678_vm1 }
 0x17e   : > { %v1247_v29 = vpop.f32.mrf.mxu0  ;;  %3233 = vmatpush.msk.msra.mxu1 %vm4687_vm9, %v2610_v16  ;;  %vm4698_vm9 = vnez %v4545_v5  ;;  %v2616_v5 = vsel %vm4627_vm11, %v2608_v1, 0.0  ;;  %vm4703_vm11 = vmmov %vm4691_vm5 }
 0x17f   : > { %v4217_v28 = vadd.f32 %v1247_v29, %v1125_v31  ;;  %3211 = vmatmul.msk.f32.vlgmr.msra.gmra.mxu2 %vm4688_vm10, %v4188_v20  ;;  %3214 = vmatmul.msk.f32.vlgmr.msra.gmra.mxu3 %vm4678_vm1, %v4188_v20  ;;  %vm4700_vm10 = vnez %v4547_v37  ;;  %v1138_v37 = vadd.f32 %v4169_v24, %v788_v58  ;;  %v1137_v31 = vadd.f32 %v4173_v12, %v765_v9 }
 0x180   : > { %3236 = vmatpush.msk.msra.mxu2 %vm4690_vm8, %v2611_v33  ;;  %3239 = vmatpush.msk.msra.mxu3 %vm4691_vm5, %v2612_v62  ;;  %v2615_v45 = vsel %vm4700_vm10, %v2593_v46, 0.0  ;;  %vm4704_vm8 = vmmov %vm4691_vm5 }
 0x181   : > { %3205 = vmatmul.msk.f32.vlgmr.msra.gmra.mxu0 %vm4692_vm3, %v4188_v20  ;;  %vm4706_vm3 = vmmov %vm4704_vm8 }
 0x182   : > { %v1293_v19 = vpop.f32.mrf.mxu2  ;;  %v1316_v41 = vpop.f32.mrf.mxu3  ;;  %3230 = vmatpush.msk.msra.mxu0 %vm4693_vm12, %v2609_v42 }
 0x183   : > { %v4241_v13 = vadd.f32 %v1293_v19, %v4122_v43  ;;  %v4244_v52 = vadd.f32 %v1316_v41, %v4125_v49  ;;  %v1273_v30 = vpop.f32.mrf.mxu1  ;;  %v785_v43 = vadd.f32 %v4052_v14, %v3950_v63  ;;  %v2594_v49 = vsel %vm2592_vm15, %v2587_v53, %v2589_v26  ;;  %vm4701_vm15 = vmmov %vm4691_vm5 }
 0x184   : > { %v4246_v59 = vadd.f32 %v1273_v30, %v1134_v55  ;;  %v2614_v47 = vsel %vm4698_vm9, %v2594_v49, 0.0  ;;  %vm4705_vm5 = vmmov %vm4678_vm1 }
 0x185   : > { %3209 = vmatmul.msk.f32.gmra.mxu1 %vm4694_vm6, %v4235_v44  ;;  %v1130_v40 = vadd.f32 %v4143_v4, %v785_v43  ;;  %v3326_v4 = vmov 0  }
 0x186   : > { %v1250_v27 = vpop.f32.mrf.mxu0  ;;  %3291 = vset.pattern.permute.xlu1 %v3326_v4  ;;  %3292 = vset.pattern.permute.xlu2 %v3326_v4 }
 0x187   : > { %v4251_v39 = vadd.f32 %v1250_v27, %v1133_v21  ;;  %3212 = vmatmul.msk.f32.gmra.mxu2 %vm4695_vm13, %v4235_v44  ;;  %3215 = vmatmul.msk.f32.gmra.mxu3 %vm4696_vm14, %v4235_v44  ;;  %v2851_v21 = vld [vmem:[%s4496_s2 + $0x8] sm:$0xff] }
 0x188   : > { %3293 = vset.pattern.permute.xlu0 %v3326_v4  ;;  %2859 = vperm.xlu2 %3292, %v2851_v21  }
 0x189   : > { %3206 = vmatmul.msk.f32.gmra.mxu0 %vm4697_vm7, %v4235_v44 }
 0x18a   : > { %v1296_v34 = vpop.f32.mrf.mxu2  ;;  %v1319_v54 = vpop.f32.mrf.mxu3 }
 0x18b   : > { %v4273_v63 = vadd.f32 %v1296_v34, %v4138_v17  ;;  %v4276_v14 = vadd.f32 %v1319_v54, %v4141_v60  ;;  %v1362_v15 = vpop.f32.mrf.mxu1  ;;  %v2850_v17 = vld [vmem:[%s4496_s2] sm:$0xff]  ;;  %v1129_v60 = vadd.f32 %v4152_v6, %v762_v48  ;;  %v2613_v6 = vsel %vm3730_vm0, %v2595_v25, 0.0  ;;  %vm4707_vm0 = vmmov %vm4678_vm1 }
 0x18c   : > { %v4280_v2 = vadd.f32 %v1362_v15, %v1130_v40  ;;  %2854 = vperm.xlu1 %3291, %v2850_v17   ;;  %vm4708_vm12 = vmmov %vm4707_vm0 }
 0x18d   : > { %3220 = vmatmul.msk.f32.vlgmr.msrb.gmra.mxu1 %vm4699_vm2, %v4188_v20  ;;  %vm4709_vm6 = vmmov %vm4707_vm0 }
 0x18e   : > { %v1339_v50 = vpop.f32.mrf.mxu0  ;;  %3245 = vmatpush.msk.msrb.mxu1 %vm4701_vm15, %v2614_v47  ;;  %vm4710_vm13 = vmmov %vm4707_vm0 }
 0x18f   : > { %v1418_v38 = vadd.f32 %v1339_v50, %v1129_v60  ;;  %3223 = vmatmul.msk.f32.vlgmr.msrb.gmra.mxu2 %vm4678_vm1, %v4188_v20  ;;  %3226 = vmatmul.msk.f32.vlgmr.msrb.gmra.mxu3 %vm4702_vm4, %v4188_v20  ;;  %vm4711_vm14 = vmmov %vm4707_vm0 }
 0x190   : > { %3251 = vmatpush.msk.msrb.mxu3 %vm4703_vm11, %v2616_v5  ;;  %3248 = vmatpush.msk.msrb.mxu2 %vm4704_vm8, %v2615_v45  ;;  %vm4712_vm7 = vmmov %vm4707_vm0 }
 0x191   : > { %3217 = vmatmul.msk.f32.vlgmr.msrb.gmra.mxu0 %vm4705_vm5, %v4188_v20  ;;  %vm4713_vm9 = vmmov %vm4707_vm0 }
 0x192   : > { %v1385_v22 = vpop.f32.mrf.mxu2  ;;  %v1408_v0 = vpop.f32.mrf.mxu3  ;;  %3242 = vmatpush.msk.msrb.mxu0 %vm4706_vm3, %v2613_v6  ;;  %vm4714_vm2 = vmmov %vm4707_vm0 }
 0x193   : > { %v1420_v16 = vadd.f32 %v1385_v22, %v4164_v3  ;;  %v1421_v18 = vadd.f32 %v1408_v0, %v4167_v23  ;;  %v1365_v35 = vpop.f32.mrf.mxu1  ;;  %v3228_v3 = vld [vmem:[%s4495_s1 + $0x80] sm:$0xff]  ;;  %vm4715_vm10 = vmmov %vm4707_vm0 }
 0x194   : > { %v1427_v10 = vadd.f32 %v1365_v35, %v1138_v37  ;;  %vm4716_vm15 = vmmov %vm4707_vm0 }
 0x195   : > { %3221 = vmatmul.msk.f32.gmra.mxu1 %vm4707_vm0, %v4235_v44  ;;  %vm4717_vm1 = vmmov %vm4707_vm0 }
 0x196   : > { %v1342_v20 = vpop.f32.mrf.mxu0  ;;  %vm4718_vm4 = vmmov %vm4707_vm0 }
 0x197   : > { %v1426_v24 = vadd.f32 %v1342_v20, %v1137_v31  ;;  %3224 = vmatmul.msk.f32.gmra.mxu2 %vm4708_vm12, %v4235_v44  ;;  %3227 = vmatmul.msk.f32.gmra.mxu3 %vm4709_vm6, %v4235_v44  ;;  %vm4719_vm11 = vmmov %vm4707_vm0 }
 0x198   : > { %vm4720_vm8 = vmmov %vm4707_vm0 }
 0x199   : > { %3218 = vmatmul.msk.f32.gmra.mxu0 %vm4710_vm13, %v4235_v44  ;;  %vm4721_vm5 = vmmov %vm4707_vm0 }
 0x19a   : > { %v1388_v32 = vpop.f32.mrf.mxu2  ;;  %v1411_v7 = vpop.f32.mrf.mxu3  ;;  %vm4722_vm3 = vmmov %vm4707_vm0 }
 0x19b   : > { %v1428_v23 = vadd.f32 %v1388_v32, %v4198_v57  ;;  %v1429_v12 = vadd.f32 %v1411_v7, %v4201_v8  ;;  %v1510_v33 = vpop.f32.mrf.mxu1  ;;  %v3229_v57 = vld [vmem:[%s4495_s1 + $0x88] sm:$0xff]  ;;  %vm4723_vm12 = vmmov %vm4707_vm0 }
 0x19c   : > { %v1655_v62 = vadd.f32 %v1510_v33, %v4205_v51  ;;  %vm4724_vm6 = vmmov %vm4707_vm0 }
 0x19d   : > { %3234 = vmatmul.msk.f32.vlgmr.msra.gmra.mxu1 %vm4711_vm14, %v3228_v3  ;;  %vm4725_vm13 = vmmov %vm4707_vm0 }
 0x19e   : > { %v1487_v29 = vpop.f32.mrf.mxu0 }
 0x19f   : > { %v1654_v42 = vadd.f32 %v1487_v29, %v4217_v28  ;;  %3237 = vmatmul.msk.f32.vlgmr.msra.gmra.mxu2 %vm4712_vm7, %v3228_v3  ;;  %3240 = vmatmul.msk.f32.vlgmr.msra.gmra.mxu3 %vm4713_vm9, %v3228_v3 }
 0x1a1   : > { %3231 = vmatmul.msk.f32.vlgmr.msra.gmra.mxu0 %vm4714_vm2, %v3228_v3 }
 0x1a2   : > { %v1533_v11 = vpop.f32.mrf.mxu2  ;;  %v1556_v55 = vpop.f32.mrf.mxu3 }
 0x1a3   : > { %v1656_v8 = vadd.f32 %v1533_v11, %v4241_v13  ;;  %v1657_v51 = vadd.f32 %v1556_v55, %v4244_v52  ;;  %v1513_v19 = vpop.f32.mrf.mxu1 }
 0x1a4   : > { %v1663_v41 = vadd.f32 %v1513_v19, %v4246_v59 }
 0x1a5   : > { %3235 = vmatmul.msk.f32.gmra.mxu1 %vm4715_vm10, %v3229_v57 }
 0x1a6   : > { %v1490_v28 = vpop.f32.mrf.mxu0 }
 0x1a7   : > { %v1662_v44 = vadd.f32 %v1490_v28, %v4251_v39  ;;  %3238 = vmatmul.msk.f32.gmra.mxu2 %vm4716_vm15, %v3229_v57  ;;  %3241 = vmatmul.msk.f32.gmra.mxu3 %vm4717_vm1, %v3229_v57 }
 0x1a9   : > { %3232 = vmatmul.msk.f32.gmra.mxu0 %vm4718_vm4, %v3229_v57 }
 0x1aa   : > { %v1536_v36 = vpop.f32.mrf.mxu2  ;;  %v1559_v30 = vpop.f32.mrf.mxu3 }
 0x1ab   : > { %v1664_v13 = vadd.f32 %v1536_v36, %v4273_v63  ;;  %v1665_v52 = vadd.f32 %v1559_v30, %v4276_v14  ;;  %v1602_v61 = vpop.f32.mrf.mxu1 }
 0x1ac   : > { %v1659_v59 = vadd.f32 %v1602_v61, %v4280_v2 }
 0x1ad   : > { %3246 = vmatmul.msk.f32.vlgmr.msrb.gmra.mxu1 %vm4719_vm11, %v3228_v3 }
 0x1ae   : > { %v1579_v26 = vpop.f32.mrf.mxu0 }
 0x1af   : > { %v1658_v27 = vadd.f32 %v1579_v26, %v1418_v38  ;;  %3249 = vmatmul.msk.f32.vlgmr.msrb.gmra.mxu2 %vm4720_vm8, %v3228_v3  ;;  %3252 = vmatmul.msk.f32.vlgmr.msrb.gmra.mxu3 %vm4721_vm5, %v3228_v3 }
 0x1b1   : > { %3243 = vmatmul.msk.f32.vlgmr.msrb.gmra.mxu0 %vm4722_vm3, %v3228_v3 }
 0x1b2   : > { %v1625_v39 = vpop.f32.mrf.mxu2  ;;  %v1648_v53 = vpop.f32.mrf.mxu3 }
 0x1b3   : > { %v1660_v56 = vadd.f32 %v1625_v39, %v1420_v16  ;;  %v1661_v43 = vadd.f32 %v1648_v53, %v1421_v18  ;;  %v1605_v49 = vpop.f32.mrf.mxu1 }
 0x1b4   : > { %v1667_v48 = vadd.f32 %v1605_v49, %v1427_v10 }
 0x1b5   : > { %3247 = vmatmul.msk.f32.gmra.mxu1 %vm4707_vm0, %v3229_v57 }
 0x1b6   : > { %v1582_v40 = vpop.f32.mrf.mxu0 }
 0x1b7   : > { %v1666_v34 = vadd.f32 %v1582_v40, %v1426_v24  ;;  %3250 = vmatmul.msk.f32.gmra.mxu2 %vm4723_vm12, %v3229_v57  ;;  %3253 = vmatmul.msk.f32.gmra.mxu3 %vm4724_vm6, %v3229_v57 }
 0x1b9   : > { %3244 = vmatmul.msk.f32.gmra.mxu0 %vm4725_vm13, %v3229_v57 }
 0x1ba   : > { %v1628_v54 = vpop.f32.mrf.mxu2  ;;  %v1651_v1 = vpop.f32.mrf.mxu3 }
 0x1bb   : > { %v1668_v46 = vadd.f32 %v1628_v54, %v1428_v23  ;;  %v1669_v63 = vadd.f32 %v1651_v1, %v1429_v12  ;;  %v1799_v14 = vpop.f32.mrf.mxu1 }
 0x1bc   : > { %v1944_v15 = vadd.f32 %v1799_v14, %v1655_v62 }
 0x1be   : > { %v1776_v47 = vpop.f32.mrf.mxu0 }
 0x1bf   : > { %v4359_v2 = vadd.f32 %v1776_v47, %v1654_v42 }
 0x1c2   : > { %v1822_v25 = vpop.f32.mrf.mxu2  ;;  %v1845_v4 = vpop.f32.mrf.mxu3 }
 0x1c3   : > { %v4361_v17 = vadd.f32 %v1822_v25, %v1656_v8  ;;  %v4363_v60 = vadd.f32 %v1845_v4, %v1657_v51  ;;  %v1802_v5 = vpop.f32.mrf.mxu1 }
 0x1c4   : > { %v4365_v45 = vadd.f32 %v1802_v5, %v1663_v41 }
 0x1c6   : > { %v1779_v50 = vpop.f32.mrf.mxu0 }
 0x1c7   : > { %v4367_v38 = vadd.f32 %v1779_v50, %v1662_v44 }
 0x1ca   : > { %v1825_v6 = vpop.f32.mrf.mxu2  ;;  %v1848_v58 = vpop.f32.mrf.mxu3 }
 0x1cb   : > { %v4369_v37 = vadd.f32 %v1825_v6, %v1664_v13  ;;  %v4371_v22 = vadd.f32 %v1848_v58, %v1665_v52  ;;  %v1891_v0 = vpop.f32.mrf.mxu1 }
 0x1cc   : > { %v4373_v9 = vadd.f32 %v1891_v0, %v1659_v59 }
 0x1ce   : > { %v1868_v16 = vpop.f32.mrf.mxu0 }
 0x1cf   : > { %v4375_v18 = vadd.f32 %v1868_v16, %v1658_v27 }
 0x1d2   : > { %v1914_v35 = vpop.f32.mrf.mxu2  ;;  %v1937_v10 = vpop.f32.mrf.mxu3 }
 0x1d3   : > { %v4377_v31 = vadd.f32 %v1914_v35, %v1660_v56  ;;  %v4379_v20 = vadd.f32 %v1937_v10, %v1661_v43  ;;  %v1894_v24 = vpop.f32.mrf.mxu1 }
 0x1d4   : > { %v4381_v32 = vadd.f32 %v1894_v24, %v1667_v48 }
 0x1d6   : > { %v1871_v7 = vpop.f32.mrf.mxu0 }
 0x1d7   : > { %v4383_v3 = vadd.f32 %v1871_v7, %v1666_v34 }
 0x1da   : > { %v1917_v23 = vpop.f32.mrf.mxu2  ;;  %v1940_v12 = vpop.f32.mrf.mxu3 }
 0x1db   : > { %v4385_v33 = vadd.f32 %v1917_v23, %v1668_v46  ;;  %v4387_v62 = vadd.f32 %v1940_v12, %v1669_v63  ;;  %v2104_v29 = vpop.f32.mrf.mxu1 }
 0x1dc   : > { %v2249_v46 = vadd.f32 %v2104_v29, %v1944_v15 }
 0x1de   : > { %v2081_v42 = vpop.f32.mrf.mxu0 }
 0x1df   : > { %v2248_v25 = vadd.f32 %v2081_v42, %v4359_v2 }
 0x1e2   : > { %v2127_v11 = vpop.f32.mrf.mxu2  ;;  %v2150_v55 = vpop.f32.mrf.mxu3 }
 0x1e3   : > { %v2107_v57 = vpop.f32.mrf.mxu1  ;;  %v2250_v0 = vadd.f32 %v2127_v11, %v4361_v17  ;;  %v2251_v16 = vadd.f32 %v2150_v55, %v4363_v60  ;;  %v4432_v60 = vpop.permute.xlu2 %2859 }
 0x1e4   : > { %v2257_v35 = vadd.f32 %v2107_v57, %v4365_v45 }
 0x1e6   : > { %v2084_v8 = vpop.f32.mrf.mxu0 }
 0x1e7   : > { %v2256_v42 = vadd.f32 %v2084_v8, %v4367_v38 }
 0x1ea   : > { %v2130_v51 = vpop.f32.mrf.mxu2  ;;  %v2153_v19 = vpop.f32.mrf.mxu3 }
 0x1eb   : > { %v2196_v41 = vpop.f32.mrf.mxu1  ;;  %v2258_v38 = vadd.f32 %v2130_v51, %v4369_v37  ;;  %v2259_v8 = vadd.f32 %v2153_v19, %v4371_v22 }
 0x1ee   : > { %v4389_v28 = vpop.f32.mrf.mxu0 }
 0x1f2   : > { %v4391_v44 = vpop.f32.mrf.mxu2  ;;  %v4393_v36 = vpop.f32.mrf.mxu3 }
 0x1f3   : > { %v4395_v30 = vpop.f32.mrf.mxu1 }
 0x1f6   : > { %v4397_v13 = vpop.f32.mrf.mxu0 }
 0x1fa   : > { %v4399_v52 = vpop.f32.mrf.mxu2  ;;  %v4401_v61 = vpop.f32.mrf.mxu3 }
 0x1fb   : > { %v2393_v59 = vpop.f32.mrf.mxu1 }
 0x1fc   : > { %v2538_v63 = vadd.f32 %v2393_v59, %v2249_v46  ;;  %v2253_v46 = vadd.f32 %v2196_v41, %v4373_v9 }
 0x1fe   : > { %v2370_v21 = vpop.f32.mrf.mxu0  ;;  %v4417_v5 = vpop.permute.xlu1 %2854 }
 0x1ff   : > { %v2537_v6 = vadd.f32 %v2370_v21, %v2248_v25 }
 0x202   : > { %v2416_v26 = vpop.f32.mrf.mxu2  ;;  %v2439_v27 = vpop.f32.mrf.mxu3 }
 0x203   : > { %v2396_v39 = vpop.f32.mrf.mxu1  ;;  %v2539_v10 = vadd.f32 %v2416_v26, %v2250_v0  ;;  %v2540_v24 = vadd.f32 %v2439_v27, %v2251_v16  ;;  %v2261_v0 = vadd.f32 %v4395_v30, %v4381_v32 }
 0x204   : > { %v2546_v23 = vadd.f32 %v2396_v39, %v2257_v35 }
 0x206   : > { %v2373_v53 = vpop.f32.mrf.mxu0 }
 0x207   : > { %v2545_v55 = vadd.f32 %v2373_v53, %v2256_v42 }
 0x20a   : > { %v2419_v56 = vpop.f32.mrf.mxu2  ;;  %v2442_v43 = vpop.f32.mrf.mxu3 }
 0x20b   : > { %v2485_v49 = vpop.f32.mrf.mxu1  ;;  %v2548_v25 = vadd.f32 %v2442_v43, %v2259_v8 }
 0x20e   : > { %v2462_v48 = vpop.f32.mrf.mxu0 }
 0x212   : > { %v4403_v40 = vpop.f32.mrf.mxu2  ;;  %v4405_v34 = vpop.f32.mrf.mxu3 }
 0x213   : > { %v4407_v54 = vpop.f32.mrf.mxu1 }
 0x214   : > { %v2550_v35 = vadd.f32 %v4407_v54, %v2261_v0 }
 0x216   : > { %v4409_v1 = vpop.f32.mrf.mxu0 }
 0x21a   : > { %v4411_v14 = vpop.f32.mrf.mxu2  ;;  %v4413_v47 = vpop.f32.mrf.mxu3 }
 0x21b   : > { %v2690_v4 = vpop.f32.mrf.mxu1 }
 0x21c   : > { %v2835_v50 = vadd.f32 %v2690_v4, %v2538_v63  ;;  %v2547_v63 = vadd.f32 %v2419_v56, %v2258_v38  ;;  %v2542_v4 = vadd.f32 %v2485_v49, %v2253_v46 }
 0x21e   : > { %v2667_v15 = vpop.f32.mrf.mxu0  ;;  %v2863_v58 = vadd.f32 %v4417_v5, %v2835_v50 }
 0x21f   : > { %v2834_v2 = vadd.f32 %v2667_v15, %v2537_v6  ;;  %v2252_v15 = vadd.f32 %v4389_v28, %v4375_v18  ;;  %v2255_v18 = vadd.f32 %v4393_v36, %v4379_v20  ;;  %v2260_v20 = vadd.f32 %v4397_v13, %v4383_v3 }
 0x220   : > { %2879 = vst [vmem:[%s4422_s25 + $0x8] sm:$0xff] %v2863_v58  ;;  %v2254_v58 = vadd.f32 %v4391_v44, %v4377_v31  ;;  %v2263_v3 = vadd.f32 %v4401_v61, %v4387_v62 }
 0x221   : > { %v2862_v7 = vadd.f32 %v4417_v5, %v2834_v2  ;;  %v2541_v19 = vadd.f32 %v2462_v48, %v2252_v15  ;;  %v2544_v16 = vadd.f32 %v4405_v34, %v2255_v18  ;;  %v2549_v34 = vadd.f32 %v4409_v1, %v2260_v20 }
 0x222   : > { %v2713_v12 = vpop.f32.mrf.mxu2  ;;  %v2736_v29 = vpop.f32.mrf.mxu3  ;;  %v2543_v48 = vadd.f32 %v4403_v40, %v2254_v58 }
 0x223   : > { %2878 = vst [vmem:[%s4422_s25] sm:$0xff] %v2862_v7  ;;  %v2836_v59 = vadd.f32 %v2713_v12, %v2539_v10  ;;  %v2837_v17 = vadd.f32 %v2736_v29, %v2540_v24  ;;  %v2693_v11 = vpop.f32.mrf.mxu1  ;;  %v2552_v12 = vadd.f32 %v4413_v47, %v2263_v3 }
 0x224   : > { %v2843_v45 = vadd.f32 %v2693_v11, %v2546_v23  ;;  %v2262_v23 = vadd.f32 %v4399_v52, %v4385_v33 }
 0x225   : > { %v2864_v57 = vadd.f32 %v4417_v5, %v2836_v59  ;;  %v2865_v21 = vadd.f32 %v4417_v5, %v2837_v17 }
 0x226   : > { %v2670_v26 = vpop.f32.mrf.mxu0  ;;  %v2871_v27 = vadd.f32 %v4432_v60, %v2843_v45  ;;  %v2551_v1 = vadd.f32 %v4411_v14, %v2262_v23 }
 0x227   : > { %2880 = vst [vmem:[%s4422_s25 + $0x10] sm:$0xff] %v2864_v57  ;;  %v2842_v39 = vadd.f32 %v2670_v26, %v2545_v55 }
 0x228   : > { %2881 = vst [vmem:[%s4422_s25 + $0x18] sm:$0xff] %v2865_v21 }
 0x229   : > { %v2870_v53 = vadd.f32 %v4432_v60, %v2842_v39  ;;  %2887 = vst [vmem:[%s4422_s25 + $0x48] sm:$0xff] %v2871_v27 }
 0x22a   : > { %v2716_v50 = vpop.f32.mrf.mxu2  ;;  %v2739_v6 = vpop.f32.mrf.mxu3 }
 0x22b   : > { %2886 = vst [vmem:[%s4422_s25 + $0x40] sm:$0xff] %v2870_v53  ;;  %v2844_v37 = vadd.f32 %v2716_v50, %v2547_v63  ;;  %v2845_v22 = vadd.f32 %v2739_v6, %v2548_v25  ;;  %v2782_v51 = vpop.f32.mrf.mxu1 }
 0x22c   : > { %v2839_v9 = vadd.f32 %v2782_v51, %v2542_v4 }
 0x22d   : > { %v2872_v41 = vadd.f32 %v4432_v60, %v2844_v37  ;;  %v2873_v56 = vadd.f32 %v4432_v60, %v2845_v22 }
 0x22e   : > { %v2867_v43 = vadd.f32 %v4417_v5, %v2839_v9  ;;  %v2759_v49 = vpop.f32.mrf.mxu0 }
 0x22f   : > { %2888 = vst [vmem:[%s4422_s25 + $0x50] sm:$0xff] %v2872_v41  ;;  %v2838_v28 = vadd.f32 %v2759_v49, %v2541_v19 }
 0x230   : > { %2889 = vst [vmem:[%s4422_s25 + $0x58] sm:$0xff] %v2873_v56 }
 0x231   : > { %2883 = vst [vmem:[%s4422_s25 + $0x28] sm:$0xff] %v2867_v43  ;;  %v2866_v2 = vadd.f32 %v4417_v5, %v2838_v28 }
 0x232   : > { %v2805_v31 = vpop.f32.mrf.mxu2  ;;  %v2828_v44 = vpop.f32.mrf.mxu3 }
 0x233   : > { %2882 = vst [vmem:[%s4422_s25 + $0x20] sm:$0xff] %v2866_v2  ;;  %v2840_v36 = vadd.f32 %v2805_v31, %v2543_v48  ;;  %v2841_v32 = vadd.f32 %v2828_v44, %v2544_v16  ;;  %v2785_v30 = vpop.f32.mrf.mxu1 }
 0x234   : > { %v2847_v40 = vadd.f32 %v2785_v30, %v2550_v35 }
 0x235   : > { %v2868_v10 = vadd.f32 %v4417_v5, %v2840_v36  ;;  %v2869_v54 = vadd.f32 %v4417_v5, %v2841_v32 }
 0x236   : > { %v2875_v24 = vadd.f32 %v4432_v60, %v2847_v40  ;;  %v2762_v7 = vpop.f32.mrf.mxu0 }
 0x237   : > { %2884 = vst [vmem:[%s4422_s25 + $0x30] sm:$0xff] %v2868_v10  ;;  %v2846_v13 = vadd.f32 %v2762_v7, %v2549_v34 }
 0x238   : > { %2885 = vst [vmem:[%s4422_s25 + $0x38] sm:$0xff] %v2869_v54 }
 0x239   : > { %2891 = vst [vmem:[%s4422_s25 + $0x68] sm:$0xff] %v2875_v24  ;;  %v2874_v5 = vadd.f32 %v4432_v60, %v2846_v13 }
 0x23a   : > { %v2808_v29 = vpop.f32.mrf.mxu2  ;;  %v2831_v42 = vpop.f32.mrf.mxu3 }
 0x23b   : > { %2890 = vst [vmem:[%s4422_s25 + $0x60] sm:$0xff] %v2874_v5  ;;  %v2848_v59 = vadd.f32 %v2808_v29, %v2551_v1  ;;  %v2849_v33 = vadd.f32 %v2831_v42, %v2552_v12 }
 0x23d   : > { %v2876_v52 = vadd.f32 %v4432_v60, %v2848_v59  ;;  %v2877_v62 = vadd.f32 %v4432_v60, %v2849_v33 }
 0x23f   : > { %2892 = vst [vmem:[%s4422_s25 + $0x70] sm:$0xff] %v2876_v52 }
 0x240   : > { %2893 = vst [vmem:[%s4422_s25 + $0x78] sm:$0xff] %v2877_v62 }
 0x241 PF: > { %s13_s14 = sadd.s32 1, %s3316_s14   ;;  %s4726_s12 = smov %s3312_s13 }
 0x242   : > { %p10_p5 = scmp.ge.s32.totalorder %s13_s14, 4   ;;  %s4727_s13 = smov %s4729_s15 }
 0x244   :  { %12 = sbr.rel (!%p10_p5) target bundleno = 2 (0x2), region = 103 }

</bundles_post_ra>
